<compile_context>
chip_gen: v5e
topology: v5e:2x2
jax: 0.10.0
libtpu: 0.0.40
codegen_flags: <defaults>
</compile_context>

<pallas_src>
import functools

import jax
import jax.numpy as jnp
from jax.experimental import pallas as pl
from jax.experimental.pallas import tpu as pltpu

LATENT = 32      # latent_size
HIDDEN = 200     # hidden width of the score MLP
WIDTH = 256      # lane-padded width used inside the kernel
N_LAYERS = 7     # 6 hidden Linear+Tanh + final Linear
BATCH = 8        # small example batch


def _score_mlp_kernel(t_ref, x_ref, w_ref, b_ref, o_ref):
    # t_ref: (TB, 1)   per-row time column (scalar t broadcast by the wrapper)
    # x_ref: (TB, LATENT)
    # w_ref: (N_LAYERS, WIDTH, WIDTH)  zero-padded weight slab
    # b_ref: (N_LAYERS + 1, WIDTH)     biases; row N_LAYERS = t-row of layer 0
    # o_ref: (TB, WIDTH)               lane-dense output (first LATENT cols valid)
    b = b_ref[...]                                   # (8, WIDTH), tiny
    x = x_ref[...]                                   # (TB, LATENT)
    t_col = t_ref[...]                               # (TB, 1)

    # Layer 0 with t folded in: x @ W0[:LATENT] + t * W0[LATENT] + b0
    h = jnp.dot(x, w_ref[0, :LATENT, :], preferred_element_type=jnp.float32)
    h = h + t_col * b[N_LAYERS:N_LAYERS + 1, :] + b[0:1, :]
    h = jnp.tanh(h)

    for i in range(1, N_LAYERS):
        h = jnp.dot(h, w_ref[i], preferred_element_type=jnp.float32) + b[i:i + 1, :]
        if i < N_LAYERS - 1:
            h = jnp.tanh(h)

    o_ref[...] = h.astype(o_ref.dtype)


def pack_params(params, latent=LATENT, width=WIDTH):
    """Pack per-layer (W, b) into one zero-padded weight slab + bias slab.

    params[i] = (W, b) with W: (in_i, out_i), b: (out_i,) or (1, out_i).
    Layer 0 has in = latent + 1; its last row (the t row) is stored as bias row
    N_LAYERS so t can be folded into the bias inside the kernel.
    """
    n = len(params)
    w_stack = jnp.zeros((n, width, width), jnp.float32)
    b_stack = jnp.zeros((n + 1, width), jnp.float32)
    for i, (W, b) in enumerate(params):
        W = jnp.asarray(W, jnp.float32)
        bb = jnp.asarray(b, jnp.float32).reshape(-1)
        if i == 0:
            w_stack = w_stack.at[0, :latent, :W.shape[1]].set(W[:latent])
            b_stack = b_stack.at[n, :W.shape[1]].set(W[latent])  # t-row
        else:
            w_stack = w_stack.at[i, :W.shape[0], :W.shape[1]].set(W)
        b_stack = b_stack.at[i, :bb.shape[0]].set(bb)
    return w_stack, b_stack


@functools.partial(jax.jit, static_argnames=())
def _run_packed(x, t_col, w_stack, b_stack):
    B = x.shape[0]
    # Batch tiling: tile of up to 128 rows, rounded to the 8-sublane granule.
    if B >= 128:
        tb = 128
    else:
        tb = max(8, ((B + 7) // 8) * 8)
    bp = ((B + tb - 1) // tb) * tb
    if bp != B:
        x = jnp.pad(x, ((0, bp - B), (0, 0)))
        t_col = jnp.pad(t_col, ((0, bp - B), (0, 0)))

    grid = (bp // tb,)
    out = pl.pallas_call(
        _score_mlp_kernel,
        out_shape=jax.ShapeDtypeStruct((bp, WIDTH), jnp.float32),
        grid=grid,
        in_specs=[
            pl.BlockSpec((tb, 1), lambda i: (i, 0)),                       # t column
            pl.BlockSpec((tb, LATENT), lambda i: (i, 0)),                  # x
            pl.BlockSpec((N_LAYERS, WIDTH, WIDTH), lambda i: (0, 0, 0)),   # weights (resident)
            pl.BlockSpec((N_LAYERS + 1, WIDTH), lambda i: (0, 0)),         # biases  (resident)
        ],
        out_specs=pl.BlockSpec((tb, WIDTH), lambda i: (i, 0)),
        compiler_params=pltpu.CompilerParams(
            dimension_semantics=("parallel",),
            vmem_limit_bytes=8 << 20,
        ),
    )(t_col, x, w_stack, b_stack)
    return out[:B, :LATENT]


def score_function_forward(x, t, params):
    """Pallas implementation of ScoreFunction.forward(x, t).

    x: (B, latent_size) float32
    t: python scalar / 0-d array (broadcast to every row, as in the PyTorch
       forward), or a per-sample array of shape (B,) / (B, 1).
    params: list of (W, b) with W shape (in, out), b shape (1, out) or (out,)
    """
    x = jnp.asarray(x, jnp.float32)
    B = x.shape[0]
    t = jnp.asarray(t, jnp.float32)
    if t.size == 1:
        t_col = jnp.broadcast_to(t.reshape(1, 1), (B, 1)).astype(jnp.float32)
    else:
        if t.size != B:
            raise ValueError(f"t must be scalar or have one entry per row; got {t.shape}")
        t_col = t.reshape(B, 1).astype(jnp.float32)

    w_stack, b_stack = pack_params(params)
    return _run_packed(x, t_col, w_stack, b_stack)


def init_params(key, latent_size=LATENT, hidden=HIDDEN):
    """Deterministic synthetic params matching nn.Sequential layer shapes."""
    dims = [latent_size + 1] + [hidden] * 6 + [latent_size]
    params = []
    for i in range(N_LAYERS):
        key, kw, kb = jax.random.split(key, 3)
        fan_in = dims[i]
        bound = 1.0 / jnp.sqrt(fan_in)
        W = jax.random.uniform(kw, (dims[i], dims[i + 1]),
                               minval=-bound, maxval=bound, dtype=jnp.float32)
        b = jax.random.uniform(kb, (1, dims[i + 1]),
                               minval=-bound, maxval=bound, dtype=jnp.float32)
        params.append((W, b))
    return params


def _reference_forward(x, t, params):
    B = x.shape[0]
    t = jnp.asarray(t, jnp.float32)
    if t.size == 1:
        t_col = jnp.broadcast_to(t.reshape(1, 1), (B, 1))
    else:
        t_col = t.reshape(B, 1)
    h = jnp.concatenate([x, t_col], axis=1)
    for i, (W, b) in enumerate(params):
        h = h @ W + jnp.asarray(b).reshape(1, -1)
        if i < len(params) - 1:
            h = jnp.tanh(h)
    return h


if __name__ == "__main__":
    key = jax.random.PRNGKey(0)
    key, kx, kp = jax.random.split(key, 3)
    x = jax.random.normal(kx, (BATCH, LATENT), dtype=jnp.float32)
    t = 0.5  # scalar diffusion time, broadcast inside forward
    params = init_params(kp)

    out = score_function_forward(x, t, params)
    out = jax.block_until_ready(out)

    ref = _reference_forward(x, t, params)
    assert out.shape == (BATCH, LATENT)
    assert jnp.allclose(out, ref, atol=1e-4, rtol=1e-4), float(jnp.max(jnp.abs(out - ref)))

    # Also exercise per-sample t (guards the t-handling correctness concern).
    t_vec = jnp.linspace(0.0, 1.0, BATCH)
    out2 = jax.block_until_ready(score_function_forward(x, t_vec, params))
    ref2 = _reference_forward(x, t_vec, params)
    assert jnp.allclose(out2, ref2, atol=1e-4, rtol=1e-4)

    # TODO(synk): beta/int_beta/sample (odeint) helpers of the module are ODE-solver
    # host logic, not part of forward(); they are intentionally not kernelized.
    print("KERNEL_OK")
</pallas_src>

<mosaic_0001>
module attributes {stable_mosaic.version = 11 : i64} {
  func.func @_score_mlp_kernel(%arg0: i32, %arg1: memref<8x1xf32, #tpu.memory_space<vmem>>, %arg2: memref<8x32xf32, #tpu.memory_space<vmem>>, %arg3: memref<7x256x256xf32, #tpu.memory_space<vmem>>, %arg4: memref<8x256xf32, #tpu.memory_space<vmem>>, %arg5: memref<8x256xf32, #tpu.memory_space<vmem>>) attributes {dimension_semantics = [#tpu.dimension_semantics<parallel>], iteration_bounds = array<i64: 1>, scalar_prefetch = 0 : i64, scratch_operands = 0 : i64, tpu.core_type = #tpu.core_type<tc>, window_params = [{transform_indices = @transform_0, window_bounds = array<i64: 8, 1>}, {transform_indices = @transform_1, window_bounds = array<i64: 8, 32>}, {pipeline_mode = #tpu.pipeline_mode<synchronous>, transform_indices = @transform_2, window_bounds = array<i64: 7, 256, 256>}, {pipeline_mode = #tpu.pipeline_mode<synchronous>, transform_indices = @transform_3, window_bounds = array<i64: 8, 256>}, {transform_indices = @transform_4, window_bounds = array<i64: 8, 256>}]} {
    %c0 = arith.constant 0 : index
    %c0_0 = arith.constant 0 : index
    %0 = vector.load %arg4[%c0, %c0_0] : memref<8x256xf32, #tpu.memory_space<vmem>>, vector<8x256xf32>
    %c0_1 = arith.constant 0 : index
    %c0_2 = arith.constant 0 : index
    %1 = vector.load %arg2[%c0_1, %c0_2] : memref<8x32xf32, #tpu.memory_space<vmem>>, vector<8x32xf32>
    %c0_3 = arith.constant 0 : index
    %c0_4 = arith.constant 0 : index
    %2 = vector.load %arg1[%c0_3, %c0_4] : memref<8x1xf32, #tpu.memory_space<vmem>>, vector<8x1xf32>
    %c0_5 = arith.constant 0 : index
    %c0_6 = arith.constant 0 : index
    %c0_7 = arith.constant 0 : index
    %3 = vector.load %arg3[%c0_5, %c0_6, %c0_7] : memref<7x256x256xf32, #tpu.memory_space<vmem>>, vector<1x32x256xf32>
    %4 = vector.shape_cast %3 : vector<1x32x256xf32> to vector<32x256xf32>
    %cst = arith.constant dense<0.000000e+00> : vector<8x256xf32>
    %5 = tpu.matmul %1, %4, %cst {dimension_numbers = #tpu.dot_dimension_numbers<[1], [0], [0], [1], [0, 0, 1, 1], [], []>} : vector<8x32xf32>, vector<32x256xf32>, vector<8x256xf32> -> vector<8x256xf32>
    %6 = vector.extract_strided_slice %0 {offsets = [7, 0], sizes = [1, 256], strides = [1, 1]} : vector<8x256xf32> to vector<1x256xf32>
    %7 = vector.broadcast %2 : vector<8x1xf32> to vector<8x256xf32>
    %8 = vector.broadcast %6 : vector<1x256xf32> to vector<8x256xf32>
    %9 = arith.mulf %7, %8 : vector<8x256xf32>
    %10 = arith.addf %5, %9 : vector<8x256xf32>
    %11 = vector.extract_strided_slice %0 {offsets = [0, 0], sizes = [1, 256], strides = [1, 1]} : vector<8x256xf32> to vector<1x256xf32>
    %12 = vector.broadcast %11 : vector<1x256xf32> to vector<8x256xf32>
    %13 = arith.addf %10, %12 : vector<8x256xf32>
    %14 = math.tanh %13 : vector<8x256xf32>
    %c1 = arith.constant 1 : index
    %c0_8 = arith.constant 0 : index
    %c0_9 = arith.constant 0 : index
    %15 = vector.load %arg3[%c1, %c0_8, %c0_9] : memref<7x256x256xf32, #tpu.memory_space<vmem>>, vector<1x256x256xf32>
    %16 = vector.shape_cast %15 : vector<1x256x256xf32> to vector<256x256xf32>
    %cst_10 = arith.constant dense<0.000000e+00> : vector<8x256xf32>
    %17 = tpu.matmul %14, %16, %cst_10 {dimension_numbers = #tpu.dot_dimension_numbers<[1], [0], [0], [1], [0, 0, 1, 1], [], []>} : vector<8x256xf32>, vector<256x256xf32>, vector<8x256xf32> -> vector<8x256xf32>
    %18 = vector.extract_strided_slice %0 {offsets = [1, 0], sizes = [1, 256], strides = [1, 1]} : vector<8x256xf32> to vector<1x256xf32>
    %19 = vector.broadcast %18 : vector<1x256xf32> to vector<8x256xf32>
    %20 = arith.addf %17, %19 : vector<8x256xf32>
    %21 = math.tanh %20 : vector<8x256xf32>
    %c2 = arith.constant 2 : index
    %c0_11 = arith.constant 0 : index
    %c0_12 = arith.constant 0 : index
    %22 = vector.load %arg3[%c2, %c0_11, %c0_12] : memref<7x256x256xf32, #tpu.memory_space<vmem>>, vector<1x256x256xf32>
    %23 = vector.shape_cast %22 : vector<1x256x256xf32> to vector<256x256xf32>
    %cst_13 = arith.constant dense<0.000000e+00> : vector<8x256xf32>
    %24 = tpu.matmul %21, %23, %cst_13 {dimension_numbers = #tpu.dot_dimension_numbers<[1], [0], [0], [1], [0, 0, 1, 1], [], []>} : vector<8x256xf32>, vector<256x256xf32>, vector<8x256xf32> -> vector<8x256xf32>
    %25 = vector.extract_strided_slice %0 {offsets = [2, 0], sizes = [1, 256], strides = [1, 1]} : vector<8x256xf32> to vector<1x256xf32>
    %26 = vector.broadcast %25 : vector<1x256xf32> to vector<8x256xf32>
    %27 = arith.addf %24, %26 : vector<8x256xf32>
    %28 = math.tanh %27 : vector<8x256xf32>
    %c3 = arith.constant 3 : index
    %c0_14 = arith.constant 0 : index
    %c0_15 = arith.constant 0 : index
    %29 = vector.load %arg3[%c3, %c0_14, %c0_15] : memref<7x256x256xf32, #tpu.memory_space<vmem>>, vector<1x256x256xf32>
    %30 = vector.shape_cast %29 : vector<1x256x256xf32> to vector<256x256xf32>
    %cst_16 = arith.constant dense<0.000000e+00> : vector<8x256xf32>
    %31 = tpu.matmul %28, %30, %cst_16 {dimension_numbers = #tpu.dot_dimension_numbers<[1], [0], [0], [1], [0, 0, 1, 1], [], []>} : vector<8x256xf32>, vector<256x256xf32>, vector<8x256xf32> -> vector<8x256xf32>
    %32 = vector.extract_strided_slice %0 {offsets = [3, 0], sizes = [1, 256], strides = [1, 1]} : vector<8x256xf32> to vector<1x256xf32>
    %33 = vector.broadcast %32 : vector<1x256xf32> to vector<8x256xf32>
    %34 = arith.addf %31, %33 : vector<8x256xf32>
    %35 = math.tanh %34 : vector<8x256xf32>
    %c4 = arith.constant 4 : index
    %c0_17 = arith.constant 0 : index
    %c0_18 = arith.constant 0 : index
    %36 = vector.load %arg3[%c4, %c0_17, %c0_18] : memref<7x256x256xf32, #tpu.memory_space<vmem>>, vector<1x256x256xf32>
    %37 = vector.shape_cast %36 : vector<1x256x256xf32> to vector<256x256xf32>
    %cst_19 = arith.constant dense<0.000000e+00> : vector<8x256xf32>
    %38 = tpu.matmul %35, %37, %cst_19 {dimension_numbers = #tpu.dot_dimension_numbers<[1], [0], [0], [1], [0, 0, 1, 1], [], []>} : vector<8x256xf32>, vector<256x256xf32>, vector<8x256xf32> -> vector<8x256xf32>
    %39 = vector.extract_strided_slice %0 {offsets = [4, 0], sizes = [1, 256], strides = [1, 1]} : vector<8x256xf32> to vector<1x256xf32>
    %40 = vector.broadcast %39 : vector<1x256xf32> to vector<8x256xf32>
    %41 = arith.addf %38, %40 : vector<8x256xf32>
    %42 = math.tanh %41 : vector<8x256xf32>
    %c5 = arith.constant 5 : index
    %c0_20 = arith.constant 0 : index
    %c0_21 = arith.constant 0 : index
    %43 = vector.load %arg3[%c5, %c0_20, %c0_21] : memref<7x256x256xf32, #tpu.memory_space<vmem>>, vector<1x256x256xf32>
    %44 = vector.shape_cast %43 : vector<1x256x256xf32> to vector<256x256xf32>
    %cst_22 = arith.constant dense<0.000000e+00> : vector<8x256xf32>
    %45 = tpu.matmul %42, %44, %cst_22 {dimension_numbers = #tpu.dot_dimension_numbers<[1], [0], [0], [1], [0, 0, 1, 1], [], []>} : vector<8x256xf32>, vector<256x256xf32>, vector<8x256xf32> -> vector<8x256xf32>
    %46 = vector.extract_strided_slice %0 {offsets = [5, 0], sizes = [1, 256], strides = [1, 1]} : vector<8x256xf32> to vector<1x256xf32>
    %47 = vector.broadcast %46 : vector<1x256xf32> to vector<8x256xf32>
    %48 = arith.addf %45, %47 : vector<8x256xf32>
    %49 = math.tanh %48 : vector<8x256xf32>
    %c6 = arith.constant 6 : index
    %c0_23 = arith.constant 0 : index
    %c0_24 = arith.constant 0 : index
    %50 = vector.load %arg3[%c6, %c0_23, %c0_24] : memref<7x256x256xf32, #tpu.memory_space<vmem>>, vector<1x256x256xf32>
    %51 = vector.shape_cast %50 : vector<1x256x256xf32> to vector<256x256xf32>
    %cst_25 = arith.constant dense<0.000000e+00> : vector<8x256xf32>
    %52 = tpu.matmul %49, %51, %cst_25 {dimension_numbers = #tpu.dot_dimension_numbers<[1], [0], [0], [1], [0, 0, 1, 1], [], []>} : vector<8x256xf32>, vector<256x256xf32>, vector<8x256xf32> -> vector<8x256xf32>
    %53 = vector.extract_strided_slice %0 {offsets = [6, 0], sizes = [1, 256], strides = [1, 1]} : vector<8x256xf32> to vector<1x256xf32>
    %54 = vector.broadcast %53 : vector<1x256xf32> to vector<8x256xf32>
    %55 = arith.addf %52, %54 : vector<8x256xf32>
    %c0_26 = arith.constant 0 : index
    %c0_27 = arith.constant 0 : index
    %56 = vector.load %arg5[%c0_26, %c0_27] : memref<8x256xf32, #tpu.memory_space<vmem>>, vector<8x256xf32>
    tpu.vector_store %arg5[%c0_26, %c0_27], %55 {strides = array<i32>} : memref<8x256xf32, #tpu.memory_space<vmem>>, vector<8x256xf32>,
    return
  }
  func.func @transform_0(%arg0: i32) -> (i32, i32) {
    %c0_i32 = arith.constant 0 : i32
    %c0_i32_0 = arith.constant 0 : i32
    return %arg0, %c0_i32 : i32, i32
  }
  func.func @transform_1(%arg0: i32) -> (i32, i32) {
    %c0_i32 = arith.constant 0 : i32
    %c0_i32_0 = arith.constant 0 : i32
    return %arg0, %c0_i32 : i32, i32
  }
  func.func @transform_2(%arg0: i32) -> (i32, i32, i32) {
    %c0_i32 = arith.constant 0 : i32
    %c0_i32_0 = arith.constant 0 : i32
    %c0_i32_1 = arith.constant 0 : i32
    %c0_i32_2 = arith.constant 0 : i32
    return %c0_i32, %c0_i32_0, %c0_i32_1 : i32, i32, i32
  }
  func.func @transform_3(%arg0: i32) -> (i32, i32) {
    %c0_i32 = arith.constant 0 : i32
    %c0_i32_0 = arith.constant 0 : i32
    %c0_i32_1 = arith.constant 0 : i32
    return %c0_i32, %c0_i32_0 : i32, i32
  }
  func.func @transform_4(%arg0: i32) -> (i32, i32) {
    %c0_i32 = arith.constant 0 : i32
    %c0_i32_0 = arith.constant 0 : i32
    return %arg0, %c0_i32 : i32, i32
  }
}

</mosaic_0001>

<bundles_post_ra>
// kernel: _run_packed.1
= control target key start
LH: loop header
LB: loop body
LE: loop exit
PB: predicated region body
PF: predicated region fallthrough
CT: control target
= control target key end

     0   :  { %9 = vsyncpa [#allocation3], 0  ;;  %s1215_s0 = inlined_call_operand.vmem [shape: f32[8,1], index: 0, kind: input, shape index: {}]   ;;  %s1216_s1 = inlined_call_operand.hbm [shape: f32[8,32], index: 1, kind: input, shape index: {}]   ;;  %s1217_s2 = inlined_call_operand.hbm [shape: f32[7,256,256], index: 2, kind: input, shape index: {}]   ;;  %s1218_s3 = inlined_call_operand.hbm [shape: f32[8,256], index: 3, kind: input, shape index: {}]   ;;  %s1219_s4 = inlined_call_operand.vmem [shape: f32[8,256], index: 4, kind: output, shape index: {}]  }
   0x1   :  { %10 = vsyncpa [#allocation5], 0  ;;  %s28_s17 = sshll.u32 %s1217_s2, 4  ;;  %s1142_s18 = smov [#allocation4]   ;;  %s29_s17 = int_to_ptr.hbm [resolvable:$true] %s28_s17 }
   0x2   :  { %s30_s19 = sshll.u32 %s1142_s18, 4  ;;  %s18_s22 = sshll.u32 %s1216_s1, 4  ;;  %s31_s19 = int_to_ptr.vmem [resolvable:$true] %s30_s19  ;;  %s19_s22 = int_to_ptr.hbm [resolvable:$true] %s18_s22 }
   0x3   :  { %s1143_s23 = smov 256   ;;  %s1144_s24 = smov 16  }
   0x4   :  { %36 = dma.hbm_to_vmem [thread:$0]  %s29_s17, 57344, %s31_s19, [#allocation5], %s1143_s23, %s1143_s23, %s1144_s24  }
   0x5   :  { %s1145_s25 = smov [#allocation2]   ;;  %s42_s29 = sshll.u32 %s1218_s3, 4  ;;  %s43_s29 = int_to_ptr.hbm [resolvable:$true] %s42_s29 }
   0x6   :  { %s20_s26 = sshll.u32 %s1145_s25, 4  ;;  %s1146_s2 = smov [#allocation6]   ;;  %s21_s26 = int_to_ptr.vmem [resolvable:$true] %s20_s26 }
   0x7   :  { %23 = dma.hbm_to_vmem [thread:$0]  %s19_s22, 128, %s21_s26, [#allocation3]  }
   0x8   :  { %s44_s30 = sshll.u32 %s1146_s2, 4  ;;  %s45_s30 = int_to_ptr.vmem [resolvable:$true] %s44_s30 }
   0x9   :  { %47 = dma.hbm_to_vmem [thread:$0]  %s43_s29, 256, %s45_s30, [#allocation5]  }
   0xa   :  { %1138 = dma.done.wait [#allocation3], 128  }
   0xb   :  { %1139 = vsyncadd [#allocation3], 4294967168 }
   0xc   :  { %1140 = dma.done.wait [#allocation5], 57600  }
   0xd   :  { %1141 = vsyncadd [#allocation5], 4294909696  ;;  %v1147_v0 = vmov 0   ;;  %v70_v1 = vld [vmem:[#allocation4 + $0x30] sm:$0xff]  ;;  %v71_v2 = vld [vmem:[#allocation4 + $0x38] sm:$0xff]  ;;  %vm81_vm0 = vcmask 261120  }
   0xe   :  { %1039 = vset.pattern.permute.xlu0 %v1147_v0  ;;  %v68_v3 = vld [vmem:[#allocation4 + $0x20] sm:$0xff]  ;;  %97 = vmatpush.msra.mxu0 %v70_v1  ;;  %v69_v4 = vld [vmem:[#allocation4 + $0x28] sm:$0xff]  ;;  %v66_v5 = vld [vmem:[#allocation4 + $0x10] sm:$0xff] }
   0xf   :  { %117 = vmatpush.msra.mxu1 %v71_v2  ;;  %v67_v6 = vld [vmem:[#allocation4 + $0x18] sm:$0xff]  ;;  %v162_v8 = vld [vmem:[#allocation4 + $0x2f0] sm:$0xff]  ;;  %v64_v10 = vld [vmem:[#allocation4] sm:$0xff] }
  0x10   :  { %98 = vmatpush.msra.mxu0 %v68_v3  ;;  %v63_v7 = vld [vmem:[%s1215_s0] sm:$0xff]  ;;  %v194_v9 = vld [vmem:[#allocation4 + $0x3f0] sm:$0xff]  ;;  %v65_v11 = vld [vmem:[#allocation4 + $0x8] sm:$0xff]  ;;  %198 = vmatpush.msra.mxu2 %v162_v8 }
  0x11   :  { %118 = vmatpush.msra.mxu1 %v69_v4  ;;  %74 = vperm.xlu0 %1039, %v63_v7   ;;  %v160_v12 = vld [vmem:[#allocation4 + $0x2e0] sm:$0xff]  ;;  %v62_v13 = vld [vmem:[#allocation2] sm:$0xff]  ;;  %v158_v17 = vld [vmem:[#allocation4 + $0x2d0] sm:$0xff] }
  0x12   :  { %99 = vmatpush.msra.mxu0 %v66_v5  ;;  %218 = vmatpush.msra.mxu3 %v194_v9  ;;  %v163_v14 = vld [vmem:[#allocation4 + $0x2f8] sm:$0xff]  ;;  %v192_v16 = vld [vmem:[#allocation4 + $0x3e0] sm:$0xff]  ;;  %v161_v18 = vld [vmem:[#allocation4 + $0x2e8] sm:$0xff] }
  0x13   :  { %119 = vmatpush.msra.mxu1 %v67_v6  ;;  %v195_v15 = vld [vmem:[#allocation4 + $0x3f8] sm:$0xff]  ;;  %199 = vmatpush.msra.mxu2 %v160_v12  ;;  %v193_v19 = vld [vmem:[#allocation4 + $0x3e8] sm:$0xff]  ;;  %v190_v20 = vld [vmem:[#allocation4 + $0x3d0] sm:$0xff] }
  0x14   :  { %100 = vmatpush.msra.mxu0 %v64_v10  ;;  %v156_v21 = vld [vmem:[#allocation4 + $0x2c0] sm:$0xff]  ;;  %219 = vmatpush.msra.mxu3 %v192_v16  ;;  %v159_v22 = vld [vmem:[#allocation4 + $0x2d8] sm:$0xff]  ;;  %v154_v25 = vld [vmem:[#allocation4 + $0x2b0] sm:$0xff] }
  0x15   :  { %120 = vmatpush.msra.mxu1 %v65_v11  ;;  %1031 = vmatmul.msk.f32.vlgmr.msra.gmra.mxu0 %vm81_vm0, %v62_v13  ;;  %v191_v23 = vld [vmem:[#allocation4 + $0x3d8] sm:$0xff]  ;;  %v188_v24 = vld [vmem:[#allocation4 + $0x3c0] sm:$0xff]  ;;  %v157_v26 = vld [vmem:[#allocation4 + $0x2c8] sm:$0xff] }
  0x16   :  { %1032 = vmatmul.msk.f32.vlgmr.msra.gmra.mxu1 %vm81_vm0, %v62_v13  ;;  %238 = vmatpush.msrb.mxu0 %v163_v14  ;;  %v189_v27 = vld [vmem:[#allocation4 + $0x3c8] sm:$0xff]  ;;  %v186_v28 = vld [vmem:[#allocation4 + $0x3b0] sm:$0xff]  ;;  %v152_v29 = vld [vmem:[#allocation4 + $0x2a0] sm:$0xff] }
  0x17   :  { %258 = vmatpush.msrb.mxu1 %v195_v15  ;;  %200 = vmatpush.msra.mxu2 %v158_v17  ;;  %v155_v30 = vld [vmem:[#allocation4 + $0x2b8] sm:$0xff]  ;;  %v184_v32 = vld [vmem:[#allocation4 + $0x3a0] sm:$0xff]  ;;  %v150_v33 = vld [vmem:[#allocation4 + $0x290] sm:$0xff] }
  0x18   :  { %239 = vmatpush.msrb.mxu0 %v161_v18  ;;  %220 = vmatpush.msra.mxu3 %v190_v20  ;;  %v187_v31 = vld [vmem:[#allocation4 + $0x3b8] sm:$0xff]  ;;  %v153_v34 = vld [vmem:[#allocation4 + $0x2a8] sm:$0xff]  ;;  %v182_v36 = vld [vmem:[#allocation4 + $0x390] sm:$0xff] }
  0x19   :  { %259 = vmatpush.msrb.mxu1 %v193_v19  ;;  %201 = vmatpush.msra.mxu2 %v156_v21  ;;  %v185_v35 = vld [vmem:[#allocation4 + $0x3a8] sm:$0xff]  ;;  %v148_v37 = vld [vmem:[#allocation4 + $0x280] sm:$0xff]  ;;  %v151_v38 = vld [vmem:[#allocation4 + $0x298] sm:$0xff] }
  0x1a   :  { %240 = vmatpush.msrb.mxu0 %v159_v22  ;;  %221 = vmatpush.msra.mxu3 %v188_v24  ;;  %v183_v39 = vld [vmem:[#allocation4 + $0x398] sm:$0xff]  ;;  %v180_v40 = vld [vmem:[#allocation4 + $0x380] sm:$0xff]  ;;  %v146_v41 = vld [vmem:[#allocation4 + $0x270] sm:$0xff] }
  0x1b   :  { %260 = vmatpush.msrb.mxu1 %v191_v23  ;;  %202 = vmatpush.msra.mxu2 %v154_v25  ;;  %v149_v42 = vld [vmem:[#allocation4 + $0x288] sm:$0xff]  ;;  %v178_v44 = vld [vmem:[#allocation4 + $0x370] sm:$0xff]  ;;  %v147_v45 = vld [vmem:[#allocation4 + $0x278] sm:$0xff] }
  0x1c   :  { %241 = vmatpush.msrb.mxu0 %v157_v26  ;;  %222 = vmatpush.msra.mxu3 %v186_v28  ;;  %v181_v43 = vld [vmem:[#allocation4 + $0x388] sm:$0xff]  ;;  %v179_v46 = vld [vmem:[#allocation4 + $0x378] sm:$0xff]  ;;  %v144_v47 = vld [vmem:[#allocation4 + $0x260] sm:$0xff] }
  0x1d   :  { %261 = vmatpush.msrb.mxu1 %v189_v27  ;;  %203 = vmatpush.msra.mxu2 %v152_v29  ;;  %v176_v48 = vld [vmem:[#allocation4 + $0x360] sm:$0xff]  ;;  %v145_v49 = vld [vmem:[#allocation4 + $0x268] sm:$0xff]  ;;  %v142_v51 = vld [vmem:[#allocation4 + $0x250] sm:$0xff] }
  0x1e   :  { %242 = vmatpush.msrb.mxu0 %v155_v30  ;;  %223 = vmatpush.msra.mxu3 %v184_v32  ;;  %v177_v50 = vld [vmem:[#allocation4 + $0x368] sm:$0xff]  ;;  %v174_v52 = vld [vmem:[#allocation4 + $0x350] sm:$0xff]  ;;  %v143_v53 = vld [vmem:[#allocation4 + $0x258] sm:$0xff] }
  0x1f   :  { %262 = vmatpush.msrb.mxu1 %v187_v31  ;;  %204 = vmatpush.msra.mxu2 %v150_v33  ;;  %v175_v54 = vld [vmem:[#allocation4 + $0x358] sm:$0xff]  ;;  %v140_v55 = vld [vmem:[#allocation4 + $0x240] sm:$0xff]  ;;  %v141_v57 = vld [vmem:[#allocation4 + $0x248] sm:$0xff] }
  0x20   :  { %243 = vmatpush.msrb.mxu0 %v153_v34  ;;  %224 = vmatpush.msra.mxu3 %v182_v36  ;;  %v172_v56 = vld [vmem:[#allocation4 + $0x340] sm:$0xff]  ;;  %v173_v58 = vld [vmem:[#allocation4 + $0x348] sm:$0xff]  ;;  %v138_v59 = vld [vmem:[#allocation4 + $0x230] sm:$0xff] }
  0x21   :  { %263 = vmatpush.msrb.mxu1 %v185_v35  ;;  %205 = vmatpush.msra.mxu2 %v148_v37  ;;  %v170_v60 = vld [vmem:[#allocation4 + $0x330] sm:$0xff]  ;;  %v139_v61 = vld [vmem:[#allocation4 + $0x238] sm:$0xff]  ;;  %v136_v63 = vld [vmem:[#allocation4 + $0x220] sm:$0xff] }
  0x22   :  { %244 = vmatpush.msrb.mxu0 %v151_v38  ;;  %225 = vmatpush.msra.mxu3 %v180_v40  ;;  %v171_v62 = vld [vmem:[#allocation4 + $0x338] sm:$0xff]  ;;  %v168_v0 = vld [vmem:[#allocation4 + $0x320] sm:$0xff]  ;;  %v137_v1 = vld [vmem:[#allocation4 + $0x228] sm:$0xff] }
  0x23   :  { %264 = vmatpush.msrb.mxu1 %v183_v39  ;;  %206 = vmatpush.msra.mxu2 %v146_v41  ;;  %v169_v2 = vld [vmem:[#allocation4 + $0x328] sm:$0xff]  ;;  %v134_v3 = vld [vmem:[#allocation4 + $0x210] sm:$0xff]  ;;  %v135_v5 = vld [vmem:[#allocation4 + $0x218] sm:$0xff] }
  0x24   :  { %245 = vmatpush.msrb.mxu0 %v149_v42  ;;  %226 = vmatpush.msra.mxu3 %v178_v44  ;;  %v166_v4 = vld [vmem:[#allocation4 + $0x310] sm:$0xff]  ;;  %v167_v6 = vld [vmem:[#allocation4 + $0x318] sm:$0xff]  ;;  %v132_v7 = vld [vmem:[#allocation4 + $0x200] sm:$0xff] }
  0x25   :  { %265 = vmatpush.msrb.mxu1 %v181_v43  ;;  %207 = vmatpush.msra.mxu2 %v144_v47  ;;  %v164_v8 = vld [vmem:[#allocation4 + $0x300] sm:$0xff]  ;;  %v133_v9 = vld [vmem:[#allocation4 + $0x208] sm:$0xff]  ;;  %v343_v11 = vld [vmem:[#allocation4 + $0x5f0] sm:$0xff] }
  0x26   :  { %246 = vmatpush.msrb.mxu0 %v147_v45  ;;  %227 = vmatpush.msra.mxu3 %v176_v48  ;;  %v165_v10 = vld [vmem:[#allocation4 + $0x308] sm:$0xff]  ;;  %v344_v12 = vld [vmem:[#allocation4 + $0x5f8] sm:$0xff]  ;;  %v341_v13 = vld [vmem:[#allocation4 + $0x5e0] sm:$0xff] }
  0x27   :  { %266 = vmatpush.msrb.mxu1 %v179_v46  ;;  %208 = vmatpush.msra.mxu2 %v142_v51  ;;  %v342_v14 = vld [vmem:[#allocation4 + $0x5e8] sm:$0xff]  ;;  %v339_v15 = vld [vmem:[#allocation4 + $0x5d0] sm:$0xff]  ;;  %v340_v16 = vld [vmem:[#allocation4 + $0x5d8] sm:$0xff] }
  0x28   :  { %247 = vmatpush.msrb.mxu0 %v145_v49  ;;  %228 = vmatpush.msra.mxu3 %v174_v52  ;;  %v311_v17 = vld [vmem:[#allocation4 + $0x4f0] sm:$0xff]  ;;  %v312_v18 = vld [vmem:[#allocation4 + $0x4f8] sm:$0xff]  ;;  %v309_v19 = vld [vmem:[#allocation4 + $0x4e0] sm:$0xff] }
  0x29   :  { %267 = vmatpush.msrb.mxu1 %v177_v50  ;;  %209 = vmatpush.msra.mxu2 %v140_v55  ;;  %v337_v20 = vld [vmem:[#allocation4 + $0x5c0] sm:$0xff]  ;;  %v338_v21 = vld [vmem:[#allocation4 + $0x5c8] sm:$0xff]  ;;  %v307_v23 = vld [vmem:[#allocation4 + $0x4d0] sm:$0xff] }
  0x2a   :  { %248 = vmatpush.msrb.mxu0 %v143_v53  ;;  %229 = vmatpush.msra.mxu3 %v172_v56  ;;  %v310_v22 = vld [vmem:[#allocation4 + $0x4e8] sm:$0xff]  ;;  %v308_v24 = vld [vmem:[#allocation4 + $0x4d8] sm:$0xff]  ;;  %v335_v25 = vld [vmem:[#allocation4 + $0x5b0] sm:$0xff] }
  0x2b   :  { %268 = vmatpush.msrb.mxu1 %v175_v54  ;;  %210 = vmatpush.msra.mxu2 %v138_v59  ;;  %v336_v26 = vld [vmem:[#allocation4 + $0x5b8] sm:$0xff]  ;;  %v305_v27 = vld [vmem:[#allocation4 + $0x4c0] sm:$0xff]  ;;  %v306_v28 = vld [vmem:[#allocation4 + $0x4c8] sm:$0xff] }
  0x2c   :  { %249 = vmatpush.msrb.mxu0 %v141_v57  ;;  %230 = vmatpush.msra.mxu3 %v170_v60  ;;  %v1185_v29 = vld [vmem:[#allocation6] sm:$0xff]  ;;  %v334_v31 = vld [vmem:[#allocation4 + $0x5a8] sm:$0xff]  ;;  %v303_v33 = vld [vmem:[#allocation4 + $0x4b0] sm:$0xff] }
  0x2d   :  { %269 = vmatpush.msrb.mxu1 %v173_v58  ;;  %211 = vmatpush.msra.mxu2 %v136_v63  ;;  %v333_v30 = vld [vmem:[#allocation4 + $0x5a0] sm:$0xff]  ;;  %v1187_v32 = vld [vmem:[#allocation6 + $0x8] sm:$0xff]  ;;  %v304_v34 = vld [vmem:[#allocation4 + $0x4b8] sm:$0xff]  ;;  %v77_v39 = vperm.slane %v1185_v29, 7  ;;  %v125_v52 = vperm.slane %v1185_v29, 0 }
  0x2e   :  { %250 = vmatpush.msrb.mxu0 %v139_v61  ;;  %231 = vmatpush.msra.mxu3 %v168_v0  ;;  %v331_v35 = vld [vmem:[#allocation4 + $0x590] sm:$0xff]  ;;  %v332_v36 = vld [vmem:[#allocation4 + $0x598] sm:$0xff]  ;;  %v301_v37 = vld [vmem:[#allocation4 + $0x4a0] sm:$0xff]  ;;  %v78_v40 = vperm.slane %v1187_v32, 7  ;;  %v126_v53 = vperm.slane %v1187_v32, 0 }
  0x2f   :  { %270 = vmatpush.msrb.mxu1 %v171_v62  ;;  %212 = vmatpush.msra.mxu2 %v134_v3  ;;  %v302_v38 = vld [vmem:[#allocation4 + $0x4a8] sm:$0xff]  ;;  %v329_v41 = vld [vmem:[#allocation4 + $0x580] sm:$0xff]  ;;  %v299_v44 = vld [vmem:[#allocation4 + $0x490] sm:$0xff] }
  0x30   :  { %251 = vmatpush.msrb.mxu0 %v137_v1  ;;  %232 = vmatpush.msra.mxu3 %v166_v4  ;;  %v330_v42 = vld [vmem:[#allocation4 + $0x588] sm:$0xff]  ;;  %v300_v45 = vld [vmem:[#allocation4 + $0x498] sm:$0xff]  ;;  %v327_v46 = vld [vmem:[#allocation4 + $0x570] sm:$0xff] }
  0x31   :  { %271 = vmatpush.msrb.mxu1 %v169_v2  ;;  %213 = vmatpush.msra.mxu2 %v132_v7  ;;  %v328_v47 = vld [vmem:[#allocation4 + $0x578] sm:$0xff]  ;;  %v325_v50 = vld [vmem:[#allocation4 + $0x560] sm:$0xff]  ;;  %v326_v51 = vld [vmem:[#allocation4 + $0x568] sm:$0xff] }
  0x32   :  { %252 = vmatpush.msrb.mxu0 %v135_v5  ;;  %233 = vmatpush.msra.mxu3 %v164_v8  ;;  %v297_v62 = vld [vmem:[#allocation4 + $0x480] sm:$0xff]  ;;  %v323_v63 = vld [vmem:[#allocation4 + $0x550] sm:$0xff]  ;;  %v298_v0 = vld [vmem:[#allocation4 + $0x488] sm:$0xff] }
  0x33   :  { %272 = vmatpush.msrb.mxu1 %v167_v6  ;;  %347 = vmatpush.msrb.mxu2 %v311_v17  ;;  %v324_v1 = vld [vmem:[#allocation4 + $0x558] sm:$0xff]  ;;  %v295_v2 = vld [vmem:[#allocation4 + $0x470] sm:$0xff]  ;;  %v321_v3 = vld [vmem:[#allocation4 + $0x540] sm:$0xff] }
  0x34   :  { %253 = vmatpush.msrb.mxu0 %v133_v9  ;;  %367 = vmatpush.msrb.mxu3 %v343_v11  ;;  %v296_v4 = vld [vmem:[#allocation4 + $0x478] sm:$0xff]  ;;  %v322_v5 = vld [vmem:[#allocation4 + $0x548] sm:$0xff]  ;;  %v293_v6 = vld [vmem:[#allocation4 + $0x460] sm:$0xff] }
  0x35   :  { %273 = vmatpush.msrb.mxu1 %v165_v10  ;;  %348 = vmatpush.msrb.mxu2 %v309_v19  ;;  %v319_v7 = vld [vmem:[#allocation4 + $0x530] sm:$0xff]  ;;  %v294_v8 = vld [vmem:[#allocation4 + $0x468] sm:$0xff]  ;;  %v320_v9 = vld [vmem:[#allocation4 + $0x538] sm:$0xff] }
  0x36   :  { %368 = vmatpush.msrb.mxu3 %v341_v13  ;;  %387 = vmatpush.msra.mxu0 %v312_v18  ;;  %v291_v10 = vld [vmem:[#allocation4 + $0x450] sm:$0xff]  ;;  %v317_v11 = vld [vmem:[#allocation4 + $0x520] sm:$0xff]  ;;  %v318_v13 = vld [vmem:[#allocation4 + $0x528] sm:$0xff] }
  0x37   :  { %407 = vmatpush.msra.mxu1 %v344_v12  ;;  %349 = vmatpush.msrb.mxu2 %v307_v23  ;;  %v292_v12 = vld [vmem:[#allocation4 + $0x458] sm:$0xff]  ;;  %v287_v18 = vld [vmem:[#allocation4 + $0x430] sm:$0xff]  ;;  %v313_v19 = vld [vmem:[#allocation4 + $0x500] sm:$0xff] }
  0x38   :  { %369 = vmatpush.msrb.mxu3 %v339_v15  ;;  %388 = vmatpush.msra.mxu0 %v310_v22  ;;  %v315_v15 = vld [vmem:[#allocation4 + $0x510] sm:$0xff]  ;;  %v316_v17 = vld [vmem:[#allocation4 + $0x518] sm:$0xff]  ;;  %v285_v22 = vld [vmem:[#allocation4 + $0x420] sm:$0xff] }
  0x39   :  { %408 = vmatpush.msra.mxu1 %v342_v14  ;;  %350 = vmatpush.msrb.mxu2 %v305_v27  ;;  %v289_v14 = vld [vmem:[#allocation4 + $0x440] sm:$0xff]  ;;  %v286_v23 = vld [vmem:[#allocation4 + $0x428] sm:$0xff] }
  0x3a   :  { %370 = vmatpush.msrb.mxu3 %v337_v20  ;;  %389 = vmatpush.msra.mxu0 %v308_v24  ;;  %v288_v20 = vld [vmem:[#allocation4 + $0x438] sm:$0xff]  ;;  %v283_v24 = vld [vmem:[#allocation4 + $0x410] sm:$0xff]  ;;  %v282_v27 = vld [vmem:[#allocation4 + $0x408] sm:$0xff] }
  0x3b   :  { %409 = vmatpush.msra.mxu1 %v340_v16  ;;  %351 = vmatpush.msrb.mxu2 %v303_v33  ;;  %v290_v16 = vld [vmem:[#allocation4 + $0x448] sm:$0xff] }
  0x3c   :  { %371 = vmatpush.msrb.mxu3 %v335_v25  ;;  %390 = vmatpush.msra.mxu0 %v306_v28  ;;  %v284_v25 = vld [vmem:[#allocation4 + $0x418] sm:$0xff]  ;;  %v492_v28 = vld [vmem:[#allocation4 + $0x7f0] sm:$0xff]  ;;  %v491_v33 = vld [vmem:[#allocation4 + $0x7e8] sm:$0xff] }
  0x3d   :  { %410 = vmatpush.msra.mxu1 %v338_v21  ;;  %352 = vmatpush.msrb.mxu2 %v301_v37  ;;  %v314_v21 = vld [vmem:[#allocation4 + $0x508] sm:$0xff]  ;;  %v489_v37 = vld [vmem:[#allocation4 + $0x7d8] sm:$0xff] }
  0x3e   :  { %372 = vmatpush.msrb.mxu3 %v333_v30  ;;  %391 = vmatpush.msra.mxu0 %v304_v34  ;;  %v493_v30 = vld [vmem:[#allocation4 + $0x7f8] sm:$0xff]  ;;  %v488_v34 = vld [vmem:[#allocation4 + $0x7d0] sm:$0xff] }
  0x3f   :  { %411 = vmatpush.msra.mxu1 %v336_v26  ;;  %353 = vmatpush.msrb.mxu2 %v299_v44  ;;  %v281_v26 = vld [vmem:[#allocation4 + $0x400] sm:$0xff]  ;;  %v484_v44 = vld [vmem:[#allocation4 + $0x7b0] sm:$0xff] }
  0x40   :  { %373 = vmatpush.msrb.mxu3 %v331_v35  ;;  %392 = vmatpush.msra.mxu0 %v302_v38  ;;  %v460_v35 = vld [vmem:[#allocation4 + $0x6f0] sm:$0xff]  ;;  %v458_v38 = vld [vmem:[#allocation4 + $0x6e0] sm:$0xff] }
  0x41   :  { %412 = vmatpush.msra.mxu1 %v334_v31  ;;  %354 = vmatpush.msrb.mxu2 %v297_v62  ;;  %v490_v31 = vld [vmem:[#allocation4 + $0x7e0] sm:$0xff] }
  0x42   :  { %374 = vmatpush.msrb.mxu3 %v329_v41  ;;  %393 = vmatpush.msra.mxu0 %v300_v45  ;;  %v456_v41 = vld [vmem:[#allocation4 + $0x6d0] sm:$0xff]  ;;  %v454_v45 = vld [vmem:[#allocation4 + $0x6c0] sm:$0xff] }
  0x43   :  { %413 = vmatpush.msra.mxu1 %v332_v36  ;;  %355 = vmatpush.msrb.mxu2 %v295_v2  ;;  %v461_v36 = vld [vmem:[#allocation4 + $0x6f8] sm:$0xff] }
  0x44   :  { %375 = vmatpush.msrb.mxu3 %v327_v46  ;;  %394 = vmatpush.msra.mxu0 %v298_v0  ;;  %v485_v46 = vld [vmem:[#allocation4 + $0x7b8] sm:$0xff]  ;;  %v452_v0 = vld [vmem:[#allocation4 + $0x6b0] sm:$0xff] }
  0x45   :  { %414 = vmatpush.msra.mxu1 %v330_v42  ;;  %356 = vmatpush.msrb.mxu2 %v293_v6  ;;  %v487_v42 = vld [vmem:[#allocation4 + $0x7c8] sm:$0xff]  ;;  %v453_v2 = vld [vmem:[#allocation4 + $0x6b8] sm:$0xff] }
  0x46   :  { %376 = vmatpush.msrb.mxu3 %v325_v50  ;;  %395 = vmatpush.msra.mxu0 %v296_v4  ;;  %v480_v50 = vld [vmem:[#allocation4 + $0x790] sm:$0xff]  ;;  %v450_v4 = vld [vmem:[#allocation4 + $0x6a0] sm:$0xff]  ;;  %v451_v6 = vld [vmem:[#allocation4 + $0x6a8] sm:$0xff] }
  0x47   :  { %415 = vmatpush.msra.mxu1 %v328_v47  ;;  %357 = vmatpush.msrb.mxu2 %v291_v10  ;;  %v455_v47 = vld [vmem:[#allocation4 + $0x6c8] sm:$0xff]  ;;  %v449_v10 = vld [vmem:[#allocation4 + $0x698] sm:$0xff] }
  0x48   :  { %377 = vmatpush.msrb.mxu3 %v323_v63  ;;  %396 = vmatpush.msra.mxu0 %v294_v8  ;;  %v448_v8 = vld [vmem:[#allocation4 + $0x690] sm:$0xff] }
  0x49   :  { %416 = vmatpush.msra.mxu1 %v326_v51  ;;  %358 = vmatpush.msrb.mxu2 %v289_v14  ;;  %v197_v51 = vperm.slane %v1187_v32, 1  ;;  %v447_v14 = vld [vmem:[#allocation4 + $0x688] sm:$0xff] }
  0x4a   :  { %378 = vmatpush.msrb.mxu3 %v321_v3  ;;  %397 = vmatpush.msra.mxu0 %v292_v12  ;;  %v479_v3 = vld [vmem:[#allocation4 + $0x788] sm:$0xff]  ;;  %v446_v12 = vld [vmem:[#allocation4 + $0x680] sm:$0xff] }
  0x4b   :  { %417 = vmatpush.msra.mxu1 %v324_v1  ;;  %359 = vmatpush.msrb.mxu2 %v287_v18  ;;  %v478_v1 = vld [vmem:[#allocation4 + $0x780] sm:$0xff]  ;;  %v445_v18 = vld [vmem:[#allocation4 + $0x678] sm:$0xff] }
  0x4c   :  { %379 = vmatpush.msrb.mxu3 %v319_v7  ;;  %398 = vmatpush.msra.mxu0 %v290_v16  ;;  %v477_v7 = vld [vmem:[#allocation4 + $0x778] sm:$0xff]  ;;  %v444_v16 = vld [vmem:[#allocation4 + $0x670] sm:$0xff] }
  0x4d   :  { %418 = vmatpush.msra.mxu1 %v322_v5  ;;  %360 = vmatpush.msrb.mxu2 %v285_v22  ;;  %v476_v5 = vld [vmem:[#allocation4 + $0x770] sm:$0xff]  ;;  %v443_v22 = vld [vmem:[#allocation4 + $0x668] sm:$0xff] }
  0x4e   :  { %380 = vmatpush.msrb.mxu3 %v317_v11  ;;  %399 = vmatpush.msra.mxu0 %v288_v20  ;;  %v475_v11 = vld [vmem:[#allocation4 + $0x768] sm:$0xff]  ;;  %v442_v20 = vld [vmem:[#allocation4 + $0x660] sm:$0xff] }
  0x4f   :  { %419 = vmatpush.msra.mxu1 %v320_v9  ;;  %361 = vmatpush.msrb.mxu2 %v283_v24  ;;  %v474_v9 = vld [vmem:[#allocation4 + $0x760] sm:$0xff]  ;;  %v440_v24 = vld [vmem:[#allocation4 + $0x650] sm:$0xff] }
  0x50   :  { %381 = vmatpush.msrb.mxu3 %v315_v15  ;;  %400 = vmatpush.msra.mxu0 %v286_v23  ;;  %v473_v15 = vld [vmem:[#allocation4 + $0x758] sm:$0xff] }
  0x51   :  { %420 = vmatpush.msra.mxu1 %v318_v13  ;;  %362 = vmatpush.msrb.mxu2 %v281_v26  ;;  %v472_v13 = vld [vmem:[#allocation4 + $0x750] sm:$0xff]  ;;  %v469_v23 = vld [vmem:[#allocation4 + $0x738] sm:$0xff] }
  0x52   :  { %382 = vmatpush.msrb.mxu3 %v313_v19  ;;  %401 = vmatpush.msra.mxu0 %v284_v25  ;;  %v471_v19 = vld [vmem:[#allocation4 + $0x748] sm:$0xff]  ;;  %v466_v25 = vld [vmem:[#allocation4 + $0x720] sm:$0xff]  ;;  %v441_v26 = vld [vmem:[#allocation4 + $0x658] sm:$0xff] }
  0x53   :  { %421 = vmatpush.msra.mxu1 %v316_v17  ;;  %v470_v17 = vld [vmem:[#allocation4 + $0x740] sm:$0xff] }
  0x54   :  { %402 = vmatpush.msra.mxu0 %v282_v27  ;;  %v467_v27 = vld [vmem:[#allocation4 + $0x728] sm:$0xff] }
  0x55   :  { %422 = vmatpush.msra.mxu1 %v314_v21  ;;  %v468_v21 = vld [vmem:[#allocation4 + $0x730] sm:$0xff] }
  0x83   :  { %v75_v43 = vpop.permute.xlu0 %74 }
  0x84   :  { %v79_v48 = vmul.f32 %v77_v39, %v75_v43  ;;  %v80_v49 = vmul.f32 %v78_v40, %v75_v43  ;;  %v486_v39 = vld [vmem:[#allocation4 + $0x7c0] sm:$0xff]  ;;  %v459_v40 = vld [vmem:[#allocation4 + $0x6e8] sm:$0xff]  ;;  %v457_v43 = vld [vmem:[#allocation4 + $0x6d8] sm:$0xff] }
  0x92   :  { %v102_v54 = vpop.f32.mrf.mxu0 }
  0x93   :  { %v122_v55 = vpop.f32.mrf.mxu1  ;;  %v103_v56 = vadd.f32 %v102_v54, %v79_v48  ;;  %v482_v48 = vld [vmem:[#allocation4 + $0x7a0] sm:$0xff] }
  0x94   :  { %v123_v57 = vadd.f32 %v122_v55, %v80_v49  ;;  %v483_v49 = vld [vmem:[#allocation4 + $0x7a8] sm:$0xff] }
  0x95   :  { %v127_v58 = vadd.f32 %v125_v52, %v103_v56  ;;  %v481_v52 = vld [vmem:[#allocation4 + $0x798] sm:$0xff] }
  0x96   :  { %v128_v59 = vadd.f32 %v126_v53, %v123_v57  ;;  %v196_v57 = vperm.slane %v1185_v29, 1 }
  0x97   :  { %1040 = vtanh.f32 %v127_v58 }
  0x98   :  { %1042 = vtanh.f32 %v128_v59 }
  0x9d   :  { %v1041_v60 = vpop.eup %1040 }
  0x9e   :  { %v1043_v61 = vpop.eup %1042  ;;  %214 = vmatmul.f32.vlgmr.msra.gmra.mxu2 %v1041_v60  ;;  %254 = vmatmul.f32.vlgmr.msrb.gmra.mxu0 %v1041_v60 }
  0x9f   :  { %234 = vmatmul.f32.vlgmr.msra.gmra.mxu3 %v1043_v61  ;;  %274 = vmatmul.f32.vlgmr.msrb.gmra.mxu1 %v1043_v61 }
  0xa0   :  { %516 = vmatpush.msra.mxu3 %v492_v28  ;;  %556 = vmatpush.msrb.mxu1 %v493_v30  ;;  %v438_v28 = vld [vmem:[#allocation4 + $0x640] sm:$0xff]  ;;  %v464_v30 = vld [vmem:[#allocation4 + $0x710] sm:$0xff] }
  0xa1   :  { %496 = vmatpush.msra.mxu2 %v460_v35  ;;  %536 = vmatpush.msrb.mxu0 %v461_v36  ;;  %v462_v35 = vld [vmem:[#allocation4 + $0x700] sm:$0xff]  ;;  %v437_v36 = vld [vmem:[#allocation4 + $0x638] sm:$0xff] }
  0xa2   :  { %517 = vmatpush.msra.mxu3 %v490_v31  ;;  %557 = vmatpush.msrb.mxu1 %v491_v33  ;;  %v439_v31 = vld [vmem:[#allocation4 + $0x648] sm:$0xff]  ;;  %v465_v33 = vld [vmem:[#allocation4 + $0x718] sm:$0xff] }
  0xa3   :  { %497 = vmatpush.msra.mxu2 %v458_v38  ;;  %537 = vmatpush.msrb.mxu0 %v459_v40  ;;  %v434_v38 = vld [vmem:[#allocation4 + $0x620] sm:$0xff]  ;;  %v432_v40 = vld [vmem:[#allocation4 + $0x610] sm:$0xff] }
  0xa4   :  { %518 = vmatpush.msra.mxu3 %v488_v34  ;;  %558 = vmatpush.msrb.mxu1 %v489_v37  ;;  %v436_v34 = vld [vmem:[#allocation4 + $0x630] sm:$0xff]  ;;  %v463_v37 = vld [vmem:[#allocation4 + $0x708] sm:$0xff] }
  0xa5   :  { %498 = vmatpush.msra.mxu2 %v456_v41  ;;  %538 = vmatpush.msrb.mxu0 %v457_v43  ;;  %v433_v41 = vld [vmem:[#allocation4 + $0x618] sm:$0xff]  ;;  %v431_v43 = vld [vmem:[#allocation4 + $0x608] sm:$0xff] }
  0xa6   :  { %519 = vmatpush.msra.mxu3 %v486_v39  ;;  %559 = vmatpush.msrb.mxu1 %v487_v42  ;;  %v435_v39 = vld [vmem:[#allocation4 + $0x628] sm:$0xff]  ;;  %v430_v42 = vld [vmem:[#allocation4 + $0x600] sm:$0xff] }
  0xa7   :  { %499 = vmatpush.msra.mxu2 %v454_v45  ;;  %539 = vmatpush.msrb.mxu0 %v455_v47  ;;  %v642_v45 = vld [vmem:[#allocation4 + $0x9f8] sm:$0xff]  ;;  %v640_v47 = vld [vmem:[#allocation4 + $0x9e8] sm:$0xff] }
  0xa8   :  { %520 = vmatpush.msra.mxu3 %v484_v44  ;;  %560 = vmatpush.msrb.mxu1 %v485_v46  ;;  %v641_v44 = vld [vmem:[#allocation4 + $0x9f0] sm:$0xff]  ;;  %v639_v46 = vld [vmem:[#allocation4 + $0x9e0] sm:$0xff] }
  0xa9   :  { %500 = vmatpush.msra.mxu2 %v452_v0  ;;  %540 = vmatpush.msrb.mxu0 %v453_v2  ;;  %v629_v0 = vld [vmem:[#allocation4 + $0x990] sm:$0xff]  ;;  %v630_v2 = vld [vmem:[#allocation4 + $0x998] sm:$0xff] }
  0xaa   :  { %521 = vmatpush.msra.mxu3 %v482_v48  ;;  %561 = vmatpush.msrb.mxu1 %v483_v49  ;;  %v637_v48 = vld [vmem:[#allocation4 + $0x9d0] sm:$0xff] }
  0xab   :  { %501 = vmatpush.msra.mxu2 %v450_v4  ;;  %541 = vmatpush.msrb.mxu0 %v451_v6  ;;  %v609_v49 = vld [vmem:[#allocation4 + $0x8f0] sm:$0xff] }
  0xac   :  { %522 = vmatpush.msra.mxu3 %v480_v50  ;;  %562 = vmatpush.msrb.mxu1 %v481_v52  ;;  %v610_v50 = vld [vmem:[#allocation4 + $0x8f8] sm:$0xff]  ;;  %v607_v52 = vld [vmem:[#allocation4 + $0x8e0] sm:$0xff] }
  0xad   :  { %502 = vmatpush.msra.mxu2 %v448_v8  ;;  %542 = vmatpush.msrb.mxu0 %v449_v10 }
  0xae   :  { %523 = vmatpush.msra.mxu3 %v478_v1  ;;  %563 = vmatpush.msrb.mxu1 %v479_v3  ;;  %v346_v1 = vperm.slane %v1187_v32, 2 }
  0xaf   :  { %503 = vmatpush.msra.mxu2 %v446_v12  ;;  %543 = vmatpush.msrb.mxu0 %v447_v14  ;;  %v601_v14 = vld [vmem:[#allocation4 + $0x8b0] sm:$0xff] }
  0xb0   :  { %524 = vmatpush.msra.mxu3 %v476_v5  ;;  %564 = vmatpush.msrb.mxu1 %v477_v7  ;;  %v345_v7 = vperm.slane %v1185_v29, 2 }
  0xb1   :  { %504 = vmatpush.msra.mxu2 %v444_v16  ;;  %544 = vmatpush.msrb.mxu0 %v445_v18  ;;  %v602_v16 = vld [vmem:[#allocation4 + $0x8b8] sm:$0xff]  ;;  %v599_v18 = vld [vmem:[#allocation4 + $0x8a0] sm:$0xff] }
  0xb2   :  { %525 = vmatpush.msra.mxu3 %v474_v9  ;;  %565 = vmatpush.msrb.mxu1 %v475_v11 }
  0xb3   :  { %505 = vmatpush.msra.mxu2 %v442_v20  ;;  %545 = vmatpush.msrb.mxu0 %v443_v22  ;;  %v600_v20 = vld [vmem:[#allocation4 + $0x8a8] sm:$0xff]  ;;  %v597_v22 = vld [vmem:[#allocation4 + $0x890] sm:$0xff] }
  0xb4   :  { %526 = vmatpush.msra.mxu3 %v472_v13  ;;  %566 = vmatpush.msrb.mxu1 %v473_v15  ;;  %v627_v15 = vld [vmem:[#allocation4 + $0x980] sm:$0xff] }
  0xb5   :  { %506 = vmatpush.msra.mxu2 %v440_v24  ;;  %546 = vmatpush.msrb.mxu0 %v441_v26  ;;  %v598_v24 = vld [vmem:[#allocation4 + $0x898] sm:$0xff]  ;;  %v595_v26 = vld [vmem:[#allocation4 + $0x880] sm:$0xff] }
  0xb6   :  { %527 = vmatpush.msra.mxu3 %v470_v17  ;;  %567 = vmatpush.msrb.mxu1 %v471_v19  ;;  %v628_v17 = vld [vmem:[#allocation4 + $0x988] sm:$0xff]  ;;  %v625_v19 = vld [vmem:[#allocation4 + $0x970] sm:$0xff] }
  0xb7   :  { %507 = vmatpush.msra.mxu2 %v438_v28  ;;  %547 = vmatpush.msrb.mxu0 %v439_v31  ;;  %v596_v28 = vld [vmem:[#allocation4 + $0x888] sm:$0xff]  ;;  %v593_v31 = vld [vmem:[#allocation4 + $0x870] sm:$0xff] }
  0xb8   :  { %528 = vmatpush.msra.mxu3 %v468_v21  ;;  %568 = vmatpush.msrb.mxu1 %v469_v23  ;;  %v626_v21 = vld [vmem:[#allocation4 + $0x978] sm:$0xff]  ;;  %v623_v23 = vld [vmem:[#allocation4 + $0x960] sm:$0xff] }
  0xb9   :  { %508 = vmatpush.msra.mxu2 %v436_v34  ;;  %548 = vmatpush.msrb.mxu0 %v437_v36  ;;  %v594_v34 = vld [vmem:[#allocation4 + $0x878] sm:$0xff]  ;;  %v591_v36 = vld [vmem:[#allocation4 + $0x860] sm:$0xff] }
  0xba   :  { %529 = vmatpush.msra.mxu3 %v466_v25  ;;  %569 = vmatpush.msrb.mxu1 %v467_v27  ;;  %v624_v25 = vld [vmem:[#allocation4 + $0x968] sm:$0xff]  ;;  %v621_v27 = vld [vmem:[#allocation4 + $0x950] sm:$0xff] }
  0xbb   :  { %509 = vmatpush.msra.mxu2 %v434_v38  ;;  %549 = vmatpush.msrb.mxu0 %v435_v39  ;;  %v592_v38 = vld [vmem:[#allocation4 + $0x868] sm:$0xff]  ;;  %v618_v39 = vld [vmem:[#allocation4 + $0x938] sm:$0xff] }
  0xbc   :  { %530 = vmatpush.msra.mxu3 %v464_v30  ;;  %570 = vmatpush.msrb.mxu1 %v465_v33  ;;  %v622_v30 = vld [vmem:[#allocation4 + $0x958] sm:$0xff]  ;;  %v619_v33 = vld [vmem:[#allocation4 + $0x940] sm:$0xff] }
  0xbd   :  { %510 = vmatpush.msra.mxu2 %v432_v40  ;;  %550 = vmatpush.msrb.mxu0 %v433_v41  ;;  %v589_v40 = vld [vmem:[#allocation4 + $0x850] sm:$0xff]  ;;  %v615_v41 = vld [vmem:[#allocation4 + $0x920] sm:$0xff] }
  0xbe   :  { %531 = vmatpush.msra.mxu3 %v462_v35  ;;  %571 = vmatpush.msrb.mxu1 %v463_v37  ;;  %v620_v35 = vld [vmem:[#allocation4 + $0x948] sm:$0xff]  ;;  %v617_v37 = vld [vmem:[#allocation4 + $0x930] sm:$0xff] }
  0xbf   :  { %511 = vmatpush.msra.mxu2 %v430_v42  ;;  %551 = vmatpush.msrb.mxu0 %v431_v43  ;;  %v590_v42 = vld [vmem:[#allocation4 + $0x858] sm:$0xff]  ;;  %v616_v43 = vld [vmem:[#allocation4 + $0x928] sm:$0xff] }
 0x11b   :  { %v255_v53 = vpop.f32.mrf.mxu0 }
 0x11c   :  { %v256_v54 = vadd.f32 %v255_v53, %v197_v51  ;;  %v275_v55 = vpop.f32.mrf.mxu1  ;;  %v638_v51 = vld [vmem:[#allocation4 + $0x9d8] sm:$0xff]  ;;  %v635_v53 = vld [vmem:[#allocation4 + $0x9c0] sm:$0xff] }
 0x11e   :  { %v276_v56 = vadd.f32 %v275_v55, %v256_v54  ;;  %v608_v54 = vld [vmem:[#allocation4 + $0x8e8] sm:$0xff]  ;;  %v605_v55 = vld [vmem:[#allocation4 + $0x8d0] sm:$0xff] }
 0x120   :  { %1044 = vtanh.f32 %v276_v56  ;;  %v636_v56 = vld [vmem:[#allocation4 + $0x9c8] sm:$0xff] }
 0x121   :  { %v215_v58 = vpop.f32.mrf.mxu2 }
 0x122   :  { %v216_v59 = vadd.f32 %v215_v58, %v196_v57  ;;  %v235_v60 = vpop.f32.mrf.mxu3  ;;  %v606_v57 = vld [vmem:[#allocation4 + $0x8d8] sm:$0xff]  ;;  %v633_v58 = vld [vmem:[#allocation4 + $0x9b0] sm:$0xff] }
 0x124   :  { %v236_v61 = vadd.f32 %v235_v60, %v216_v59  ;;  %v603_v59 = vld [vmem:[#allocation4 + $0x8c0] sm:$0xff]  ;;  %v634_v60 = vld [vmem:[#allocation4 + $0x9b8] sm:$0xff] }
 0x126   :  { %v1045_v62 = vpop.eup %1044  ;;  %1046 = vtanh.f32 %v236_v61  ;;  %v604_v61 = vld [vmem:[#allocation4 + $0x8c8] sm:$0xff] }
 0x127   :  { %383 = vmatmul.f32.vlgmr.msrb.gmra.mxu3 %v1045_v62  ;;  %423 = vmatmul.f32.vlgmr.msra.gmra.mxu1 %v1045_v62  ;;  %v631_v62 = vld [vmem:[#allocation4 + $0x9a0] sm:$0xff] }
 0x128   :  { %665 = vmatpush.msrb.mxu3 %v641_v44  ;;  %705 = vmatpush.msra.mxu1 %v642_v45  ;;  %v587_v44 = vld [vmem:[#allocation4 + $0x840] sm:$0xff]  ;;  %v613_v45 = vld [vmem:[#allocation4 + $0x910] sm:$0xff] }
 0x12a   :  { %666 = vmatpush.msrb.mxu3 %v639_v46  ;;  %706 = vmatpush.msra.mxu1 %v640_v47  ;;  %v588_v46 = vld [vmem:[#allocation4 + $0x848] sm:$0xff]  ;;  %v614_v47 = vld [vmem:[#allocation4 + $0x918] sm:$0xff] }
 0x12c   :  { %v1047_v63 = vpop.eup %1046  ;;  %667 = vmatpush.msrb.mxu3 %v637_v48  ;;  %707 = vmatpush.msra.mxu1 %v638_v51  ;;  %v585_v48 = vld [vmem:[#allocation4 + $0x830] sm:$0xff]  ;;  %v612_v51 = vld [vmem:[#allocation4 + $0x908] sm:$0xff] }
 0x12d   :  { %363 = vmatmul.f32.vlgmr.msrb.gmra.mxu2 %v1047_v63  ;;  %403 = vmatmul.f32.vlgmr.msra.gmra.mxu0 %v1047_v63  ;;  %v632_v63 = vld [vmem:[#allocation4 + $0x9a8] sm:$0xff] }
 0x12e   :  { %645 = vmatpush.msrb.mxu2 %v609_v49  ;;  %685 = vmatpush.msra.mxu0 %v610_v50  ;;  %v611_v49 = vld [vmem:[#allocation4 + $0x900] sm:$0xff]  ;;  %v586_v50 = vld [vmem:[#allocation4 + $0x838] sm:$0xff] }
 0x12f   :  { %668 = vmatpush.msrb.mxu3 %v635_v53  ;;  %708 = vmatpush.msra.mxu1 %v636_v56  ;;  %v584_v53 = vld [vmem:[#allocation4 + $0x828] sm:$0xff]  ;;  %v579_v56 = vld [vmem:[#allocation4 + $0x800] sm:$0xff] }
 0x130   :  { %646 = vmatpush.msrb.mxu2 %v607_v52  ;;  %686 = vmatpush.msra.mxu0 %v608_v54  ;;  %v583_v52 = vld [vmem:[#allocation4 + $0x820] sm:$0xff]  ;;  %v581_v54 = vld [vmem:[#allocation4 + $0x810] sm:$0xff] }
 0x131   :  { %669 = vmatpush.msrb.mxu3 %v633_v58  ;;  %709 = vmatpush.msra.mxu1 %v634_v60  ;;  %v790_v58 = vld [vmem:[#allocation4 + $0xbf0] sm:$0xff]  ;;  %v788_v60 = vld [vmem:[#allocation4 + $0xbe0] sm:$0xff] }
 0x132   :  { %647 = vmatpush.msrb.mxu2 %v605_v55  ;;  %687 = vmatpush.msra.mxu0 %v606_v57  ;;  %v582_v55 = vld [vmem:[#allocation4 + $0x818] sm:$0xff]  ;;  %v580_v57 = vld [vmem:[#allocation4 + $0x808] sm:$0xff] }
 0x133   :  { %670 = vmatpush.msrb.mxu3 %v631_v62  ;;  %710 = vmatpush.msra.mxu1 %v632_v63  ;;  %v786_v62 = vld [vmem:[#allocation4 + $0xbd0] sm:$0xff] }
 0x134   :  { %648 = vmatpush.msrb.mxu2 %v603_v59  ;;  %688 = vmatpush.msra.mxu0 %v604_v61  ;;  %v791_v59 = vld [vmem:[#allocation4 + $0xbf8] sm:$0xff]  ;;  %v789_v61 = vld [vmem:[#allocation4 + $0xbe8] sm:$0xff]  ;;  %v758_v63 = vld [vmem:[#allocation4 + $0xaf0] sm:$0xff] }
 0x135   :  { %671 = vmatpush.msrb.mxu3 %v629_v0  ;;  %711 = vmatpush.msra.mxu1 %v630_v2  ;;  %v759_v0 = vld [vmem:[#allocation4 + $0xaf8] sm:$0xff]  ;;  %v756_v2 = vld [vmem:[#allocation4 + $0xae0] sm:$0xff] }
 0x136   :  { %649 = vmatpush.msrb.mxu2 %v601_v14  ;;  %689 = vmatpush.msra.mxu0 %v602_v16  ;;  %v778_v14 = vld [vmem:[#allocation4 + $0xb90] sm:$0xff]  ;;  %v779_v16 = vld [vmem:[#allocation4 + $0xb98] sm:$0xff] }
 0x137   :  { %672 = vmatpush.msrb.mxu3 %v627_v15  ;;  %712 = vmatpush.msra.mxu1 %v628_v17  ;;  %v495_v15 = vperm.slane %v1187_v32, 3 }
 0x138   :  { %650 = vmatpush.msrb.mxu2 %v599_v18  ;;  %690 = vmatpush.msra.mxu0 %v600_v20 }
 0x139   :  { %673 = vmatpush.msrb.mxu3 %v625_v19  ;;  %713 = vmatpush.msra.mxu1 %v626_v21  ;;  %v494_v21 = vperm.slane %v1185_v29, 3  ;;  %v774_v29 = vld [vmem:[#allocation4 + $0xb70] sm:$0xff] }
 0x13a   :  { %651 = vmatpush.msrb.mxu2 %v597_v22  ;;  %691 = vmatpush.msra.mxu0 %v598_v24 }
 0x13b   :  { %674 = vmatpush.msrb.mxu3 %v623_v23  ;;  %714 = vmatpush.msra.mxu1 %v624_v25 }
 0x13c   :  { %652 = vmatpush.msrb.mxu2 %v595_v26  ;;  %692 = vmatpush.msra.mxu0 %v596_v28  ;;  %v776_v28 = vld [vmem:[#allocation4 + $0xb80] sm:$0xff] }
 0x13d   :  { %675 = vmatpush.msrb.mxu3 %v621_v27  ;;  %715 = vmatpush.msra.mxu1 %v622_v30  ;;  %v750_v27 = vld [vmem:[#allocation4 + $0xab0] sm:$0xff]  ;;  %v751_v30 = vld [vmem:[#allocation4 + $0xab8] sm:$0xff] }
 0x13e   :  { %653 = vmatpush.msrb.mxu2 %v593_v31  ;;  %693 = vmatpush.msra.mxu0 %v594_v34  ;;  %v777_v31 = vld [vmem:[#allocation4 + $0xb88] sm:$0xff] }
 0x13f   :  { %676 = vmatpush.msrb.mxu3 %v619_v33  ;;  %716 = vmatpush.msra.mxu1 %v620_v35  ;;  %v748_v33 = vld [vmem:[#allocation4 + $0xaa0] sm:$0xff]  ;;  %v749_v34 = vld [vmem:[#allocation4 + $0xaa8] sm:$0xff]  ;;  %v775_v35 = vld [vmem:[#allocation4 + $0xb78] sm:$0xff] }
 0x140   :  { %654 = vmatpush.msrb.mxu2 %v591_v36  ;;  %694 = vmatpush.msra.mxu0 %v592_v38  ;;  %v746_v36 = vld [vmem:[#allocation4 + $0xa90] sm:$0xff]  ;;  %v747_v38 = vld [vmem:[#allocation4 + $0xa98] sm:$0xff] }
 0x141   :  { %677 = vmatpush.msrb.mxu3 %v617_v37  ;;  %717 = vmatpush.msra.mxu1 %v618_v39  ;;  %v772_v37 = vld [vmem:[#allocation4 + $0xb60] sm:$0xff]  ;;  %v773_v39 = vld [vmem:[#allocation4 + $0xb68] sm:$0xff] }
 0x142   :  { %655 = vmatpush.msrb.mxu2 %v589_v40  ;;  %695 = vmatpush.msra.mxu0 %v590_v42  ;;  %v744_v40 = vld [vmem:[#allocation4 + $0xa80] sm:$0xff]  ;;  %v745_v42 = vld [vmem:[#allocation4 + $0xa88] sm:$0xff] }
 0x143   :  { %678 = vmatpush.msrb.mxu3 %v615_v41  ;;  %718 = vmatpush.msra.mxu1 %v616_v43  ;;  %v770_v41 = vld [vmem:[#allocation4 + $0xb50] sm:$0xff]  ;;  %v771_v43 = vld [vmem:[#allocation4 + $0xb58] sm:$0xff] }
 0x144   :  { %656 = vmatpush.msrb.mxu2 %v587_v44  ;;  %696 = vmatpush.msra.mxu0 %v588_v46  ;;  %v742_v44 = vld [vmem:[#allocation4 + $0xa70] sm:$0xff]  ;;  %v743_v46 = vld [vmem:[#allocation4 + $0xa78] sm:$0xff] }
 0x145   :  { %679 = vmatpush.msrb.mxu3 %v613_v45  ;;  %719 = vmatpush.msra.mxu1 %v614_v47  ;;  %v768_v45 = vld [vmem:[#allocation4 + $0xb40] sm:$0xff]  ;;  %v769_v47 = vld [vmem:[#allocation4 + $0xb48] sm:$0xff] }
 0x146   :  { %657 = vmatpush.msrb.mxu2 %v585_v48  ;;  %697 = vmatpush.msra.mxu0 %v586_v50  ;;  %v740_v48 = vld [vmem:[#allocation4 + $0xa60] sm:$0xff]  ;;  %v741_v50 = vld [vmem:[#allocation4 + $0xa68] sm:$0xff] }
 0x147   :  { %680 = vmatpush.msrb.mxu3 %v611_v49  ;;  %720 = vmatpush.msra.mxu1 %v612_v51  ;;  %v766_v49 = vld [vmem:[#allocation4 + $0xb30] sm:$0xff]  ;;  %v767_v51 = vld [vmem:[#allocation4 + $0xb38] sm:$0xff] }
 0x148   :  { %658 = vmatpush.msrb.mxu2 %v583_v52  ;;  %698 = vmatpush.msra.mxu0 %v584_v53  ;;  %v738_v52 = vld [vmem:[#allocation4 + $0xa50] sm:$0xff]  ;;  %v764_v53 = vld [vmem:[#allocation4 + $0xb20] sm:$0xff] }
 0x14a   :  { %659 = vmatpush.msrb.mxu2 %v581_v54  ;;  %699 = vmatpush.msra.mxu0 %v582_v55  ;;  %v739_v54 = vld [vmem:[#allocation4 + $0xa58] sm:$0xff]  ;;  %v765_v55 = vld [vmem:[#allocation4 + $0xb28] sm:$0xff] }
 0x14c   :  { %660 = vmatpush.msrb.mxu2 %v579_v56  ;;  %700 = vmatpush.msra.mxu0 %v580_v57  ;;  %v736_v56 = vld [vmem:[#allocation4 + $0xa40] sm:$0xff]  ;;  %v762_v57 = vld [vmem:[#allocation4 + $0xb10] sm:$0xff] }
 0x1a4   :  { %v424_v5 = vpop.f32.mrf.mxu1 }
 0x1aa   :  { %v404_v3 = vpop.f32.mrf.mxu0  ;;  %v384_v10 = vpop.f32.mrf.mxu3 }
 0x1ab   :  { %v405_v4 = vadd.f32 %v404_v3, %v346_v1  ;;  %v787_v1 = vld [vmem:[#allocation4 + $0xbd8] sm:$0xff]  ;;  %v784_v3 = vld [vmem:[#allocation4 + $0xbc0] sm:$0xff] }
 0x1ad   :  { %v425_v6 = vadd.f32 %v424_v5, %v405_v4  ;;  %v757_v4 = vld [vmem:[#allocation4 + $0xae8] sm:$0xff]  ;;  %v754_v5 = vld [vmem:[#allocation4 + $0xad0] sm:$0xff] }
 0x1af   :  { %1048 = vtanh.f32 %v425_v6  ;;  %v785_v6 = vld [vmem:[#allocation4 + $0xbc8] sm:$0xff] }
 0x1b0   :  { %v364_v8 = vpop.f32.mrf.mxu2 }
 0x1b1   :  { %v365_v9 = vadd.f32 %v364_v8, %v345_v7  ;;  %v755_v7 = vld [vmem:[#allocation4 + $0xad8] sm:$0xff]  ;;  %v782_v8 = vld [vmem:[#allocation4 + $0xbb0] sm:$0xff] }
 0x1b3   :  { %v385_v11 = vadd.f32 %v384_v10, %v365_v9  ;;  %v752_v9 = vld [vmem:[#allocation4 + $0xac0] sm:$0xff]  ;;  %v783_v10 = vld [vmem:[#allocation4 + $0xbb8] sm:$0xff] }
 0x1b5   :  { %v1049_v12 = vpop.eup %1048  ;;  %1050 = vtanh.f32 %v385_v11  ;;  %v753_v11 = vld [vmem:[#allocation4 + $0xac8] sm:$0xff] }
 0x1b6   :  { %532 = vmatmul.f32.vlgmr.msra.gmra.mxu3 %v1049_v12  ;;  %572 = vmatmul.f32.vlgmr.msrb.gmra.mxu1 %v1049_v12  ;;  %v780_v12 = vld [vmem:[#allocation4 + $0xba0] sm:$0xff] }
 0x1b7   :  { %814 = vmatpush.msra.mxu3 %v790_v58  ;;  %854 = vmatpush.msrb.mxu1 %v791_v59  ;;  %v737_v58 = vld [vmem:[#allocation4 + $0xa48] sm:$0xff]  ;;  %v763_v59 = vld [vmem:[#allocation4 + $0xb18] sm:$0xff] }
 0x1b9   :  { %815 = vmatpush.msra.mxu3 %v788_v60  ;;  %855 = vmatpush.msrb.mxu1 %v789_v61  ;;  %v734_v60 = vld [vmem:[#allocation4 + $0xa30] sm:$0xff]  ;;  %v760_v61 = vld [vmem:[#allocation4 + $0xb00] sm:$0xff] }
 0x1bb   :  { %v1051_v13 = vpop.eup %1050  ;;  %816 = vmatpush.msra.mxu3 %v786_v62  ;;  %856 = vmatpush.msrb.mxu1 %v787_v1  ;;  %v735_v62 = vld [vmem:[#allocation4 + $0xa38] sm:$0xff]  ;;  %v733_v1 = vld [vmem:[#allocation4 + $0xa28] sm:$0xff] }
 0x1bc   :  { %512 = vmatmul.f32.vlgmr.msra.gmra.mxu2 %v1051_v13  ;;  %552 = vmatmul.f32.vlgmr.msrb.gmra.mxu0 %v1051_v13  ;;  %v781_v13 = vld [vmem:[#allocation4 + $0xba8] sm:$0xff] }
 0x1bd   :  { %794 = vmatpush.msra.mxu2 %v758_v63  ;;  %834 = vmatpush.msrb.mxu0 %v759_v0  ;;  %v761_v63 = vld [vmem:[#allocation4 + $0xb08] sm:$0xff]  ;;  %v732_v0 = vld [vmem:[#allocation4 + $0xa20] sm:$0xff] }
 0x1be   :  { %817 = vmatpush.msra.mxu3 %v784_v3  ;;  %857 = vmatpush.msrb.mxu1 %v785_v6  ;;  %v731_v3 = vld [vmem:[#allocation4 + $0xa18] sm:$0xff]  ;;  %v939_v6 = vld [vmem:[#allocation4 + $0xdf0] sm:$0xff] }
 0x1bf   :  { %795 = vmatpush.msra.mxu2 %v756_v2  ;;  %835 = vmatpush.msrb.mxu0 %v757_v4  ;;  %v730_v2 = vld [vmem:[#allocation4 + $0xa10] sm:$0xff]  ;;  %v728_v4 = vld [vmem:[#allocation4 + $0xa00] sm:$0xff] }
 0x1c0   :  { %818 = vmatpush.msra.mxu3 %v782_v8  ;;  %858 = vmatpush.msrb.mxu1 %v783_v10  ;;  %v937_v8 = vld [vmem:[#allocation4 + $0xde0] sm:$0xff]  ;;  %v935_v10 = vld [vmem:[#allocation4 + $0xdd0] sm:$0xff] }
 0x1c1   :  { %796 = vmatpush.msra.mxu2 %v754_v5  ;;  %836 = vmatpush.msrb.mxu0 %v755_v7  ;;  %v729_v5 = vld [vmem:[#allocation4 + $0xa08] sm:$0xff]  ;;  %v940_v7 = vld [vmem:[#allocation4 + $0xdf8] sm:$0xff] }
 0x1c2   :  { %819 = vmatpush.msra.mxu3 %v780_v12  ;;  %859 = vmatpush.msrb.mxu1 %v781_v13  ;;  %v908_v12 = vld [vmem:[#allocation4 + $0xcf8] sm:$0xff] }
 0x1c3   :  { %797 = vmatpush.msra.mxu2 %v752_v9  ;;  %837 = vmatpush.msrb.mxu0 %v753_v11  ;;  %v938_v9 = vld [vmem:[#allocation4 + $0xde8] sm:$0xff]  ;;  %v907_v11 = vld [vmem:[#allocation4 + $0xcf0] sm:$0xff]  ;;  %v936_v13 = vld [vmem:[#allocation4 + $0xdd8] sm:$0xff] }
 0x1c4   :  { %820 = vmatpush.msra.mxu3 %v778_v14  ;;  %860 = vmatpush.msrb.mxu1 %v779_v16  ;;  %v905_v14 = vld [vmem:[#allocation4 + $0xce0] sm:$0xff]  ;;  %v906_v16 = vld [vmem:[#allocation4 + $0xce8] sm:$0xff] }
 0x1c5   :  { %798 = vmatpush.msra.mxu2 %v750_v27  ;;  %838 = vmatpush.msrb.mxu0 %v751_v30 }
 0x1c6   :  { %821 = vmatpush.msra.mxu3 %v776_v28  ;;  %861 = vmatpush.msrb.mxu1 %v777_v31  ;;  %v928_v28 = vld [vmem:[#allocation4 + $0xd98] sm:$0xff] }
 0x1c7   :  { %799 = vmatpush.msra.mxu2 %v748_v33  ;;  %839 = vmatpush.msrb.mxu0 %v749_v34  ;;  %v1202_v34 = vld [vmem:[#allocation6] sm:$0xff] }
 0x1c8   :  { %822 = vmatpush.msra.mxu3 %v774_v29  ;;  %862 = vmatpush.msrb.mxu1 %v775_v35  ;;  %v643_v35 = vperm.slane %v1202_v34, 4 }
 0x1c9   :  { %800 = vmatpush.msra.mxu2 %v746_v36  ;;  %840 = vmatpush.msrb.mxu0 %v747_v38 }
 0x1ca   :  { %823 = vmatpush.msra.mxu3 %v772_v37  ;;  %863 = vmatpush.msrb.mxu1 %v773_v39 }
 0x1cb   :  { %801 = vmatpush.msra.mxu2 %v744_v40  ;;  %841 = vmatpush.msrb.mxu0 %v745_v42  ;;  %v899_v42 = vld [vmem:[#allocation4 + $0xcb0] sm:$0xff] }
 0x1cc   :  { %824 = vmatpush.msra.mxu3 %v770_v41  ;;  %864 = vmatpush.msrb.mxu1 %v771_v43  ;;  %v925_v43 = vld [vmem:[#allocation4 + $0xd80] sm:$0xff] }
 0x1cd   :  { %802 = vmatpush.msra.mxu2 %v742_v44  ;;  %842 = vmatpush.msrb.mxu0 %v743_v46  ;;  %v900_v44 = vld [vmem:[#allocation4 + $0xcb8] sm:$0xff]  ;;  %v897_v46 = vld [vmem:[#allocation4 + $0xca0] sm:$0xff] }
 0x1ce   :  { %825 = vmatpush.msra.mxu3 %v768_v45  ;;  %865 = vmatpush.msrb.mxu1 %v769_v47  ;;  %v926_v45 = vld [vmem:[#allocation4 + $0xd88] sm:$0xff]  ;;  %v923_v47 = vld [vmem:[#allocation4 + $0xd70] sm:$0xff] }
 0x1cf   :  { %803 = vmatpush.msra.mxu2 %v740_v48  ;;  %843 = vmatpush.msrb.mxu0 %v741_v50  ;;  %v898_v48 = vld [vmem:[#allocation4 + $0xca8] sm:$0xff]  ;;  %v895_v50 = vld [vmem:[#allocation4 + $0xc90] sm:$0xff] }
 0x1d0   :  { %826 = vmatpush.msra.mxu3 %v766_v49  ;;  %866 = vmatpush.msrb.mxu1 %v767_v51  ;;  %v924_v49 = vld [vmem:[#allocation4 + $0xd78] sm:$0xff]  ;;  %v921_v51 = vld [vmem:[#allocation4 + $0xd60] sm:$0xff] }
 0x1d1   :  { %804 = vmatpush.msra.mxu2 %v738_v52  ;;  %844 = vmatpush.msrb.mxu0 %v739_v54  ;;  %v896_v52 = vld [vmem:[#allocation4 + $0xc98] sm:$0xff]  ;;  %v893_v54 = vld [vmem:[#allocation4 + $0xc80] sm:$0xff] }
 0x1d2   :  { %827 = vmatpush.msra.mxu3 %v764_v53  ;;  %867 = vmatpush.msrb.mxu1 %v765_v55  ;;  %v922_v53 = vld [vmem:[#allocation4 + $0xd68] sm:$0xff]  ;;  %v919_v55 = vld [vmem:[#allocation4 + $0xd50] sm:$0xff] }
 0x1d3   :  { %805 = vmatpush.msra.mxu2 %v736_v56  ;;  %845 = vmatpush.msrb.mxu0 %v737_v58  ;;  %v894_v56 = vld [vmem:[#allocation4 + $0xc88] sm:$0xff]  ;;  %v891_v58 = vld [vmem:[#allocation4 + $0xc70] sm:$0xff] }
 0x1d4   :  { %828 = vmatpush.msra.mxu3 %v762_v57  ;;  %868 = vmatpush.msrb.mxu1 %v763_v59  ;;  %v920_v57 = vld [vmem:[#allocation4 + $0xd58] sm:$0xff]  ;;  %v917_v59 = vld [vmem:[#allocation4 + $0xd40] sm:$0xff] }
 0x1d5   :  { %806 = vmatpush.msra.mxu2 %v734_v60  ;;  %846 = vmatpush.msrb.mxu0 %v735_v62  ;;  %v892_v60 = vld [vmem:[#allocation4 + $0xc78] sm:$0xff]  ;;  %v889_v62 = vld [vmem:[#allocation4 + $0xc60] sm:$0xff] }
 0x1d6   :  { %829 = vmatpush.msra.mxu3 %v760_v61  ;;  %869 = vmatpush.msrb.mxu1 %v761_v63  ;;  %v918_v61 = vld [vmem:[#allocation4 + $0xd48] sm:$0xff]  ;;  %v915_v63 = vld [vmem:[#allocation4 + $0xd30] sm:$0xff] }
 0x1d7   :  { %807 = vmatpush.msra.mxu2 %v732_v0  ;;  %847 = vmatpush.msrb.mxu0 %v733_v1  ;;  %v890_v0 = vld [vmem:[#allocation4 + $0xc68] sm:$0xff]  ;;  %v916_v1 = vld [vmem:[#allocation4 + $0xd38] sm:$0xff] }
 0x1d9   :  { %808 = vmatpush.msra.mxu2 %v730_v2  ;;  %848 = vmatpush.msrb.mxu0 %v731_v3  ;;  %v887_v2 = vld [vmem:[#allocation4 + $0xc50] sm:$0xff]  ;;  %v913_v3 = vld [vmem:[#allocation4 + $0xd20] sm:$0xff] }
 0x1db   :  { %809 = vmatpush.msra.mxu2 %v728_v4  ;;  %849 = vmatpush.msrb.mxu0 %v729_v5  ;;  %v888_v4 = vld [vmem:[#allocation4 + $0xc58] sm:$0xff]  ;;  %v914_v5 = vld [vmem:[#allocation4 + $0xd28] sm:$0xff] }
 0x233   :  { %v573_v19 = vpop.f32.mrf.mxu1 }
 0x239   :  { %v553_v17 = vpop.f32.mrf.mxu0  ;;  %v533_v24 = vpop.f32.mrf.mxu3 }
 0x23a   :  { %v554_v18 = vadd.f32 %v553_v17, %v495_v15  ;;  %v933_v15 = vld [vmem:[#allocation4 + $0xdc0] sm:$0xff]  ;;  %v903_v17 = vld [vmem:[#allocation4 + $0xcd0] sm:$0xff] }
 0x23c   :  { %v574_v20 = vadd.f32 %v573_v19, %v554_v18  ;;  %v934_v18 = vld [vmem:[#allocation4 + $0xdc8] sm:$0xff]  ;;  %v904_v19 = vld [vmem:[#allocation4 + $0xcd8] sm:$0xff] }
 0x23e   :  { %1052 = vtanh.f32 %v574_v20  ;;  %v931_v20 = vld [vmem:[#allocation4 + $0xdb0] sm:$0xff] }
 0x23f   :  { %v513_v22 = vpop.f32.mrf.mxu2 }
 0x240   :  { %v514_v23 = vadd.f32 %v513_v22, %v494_v21  ;;  %v901_v21 = vld [vmem:[#allocation4 + $0xcc0] sm:$0xff]  ;;  %v932_v22 = vld [vmem:[#allocation4 + $0xdb8] sm:$0xff] }
 0x242   :  { %v534_v25 = vadd.f32 %v533_v24, %v514_v23  ;;  %v902_v23 = vld [vmem:[#allocation4 + $0xcc8] sm:$0xff]  ;;  %v929_v24 = vld [vmem:[#allocation4 + $0xda0] sm:$0xff] }
 0x244   :  { %v1053_v26 = vpop.eup %1052  ;;  %1054 = vtanh.f32 %v534_v25  ;;  %v930_v25 = vld [vmem:[#allocation4 + $0xda8] sm:$0xff] }
 0x245   :  { %681 = vmatmul.f32.vlgmr.msrb.gmra.mxu3 %v1053_v26  ;;  %721 = vmatmul.f32.vlgmr.msra.gmra.mxu1 %v1053_v26  ;;  %v927_v26 = vld [vmem:[#allocation4 + $0xd90] sm:$0xff] }
 0x246   :  { %963 = vmatpush.msrb.mxu3 %v939_v6  ;;  %1003 = vmatpush.msra.mxu1 %v940_v7  ;;  %v885_v6 = vld [vmem:[#allocation4 + $0xc40] sm:$0xff]  ;;  %v911_v7 = vld [vmem:[#allocation4 + $0xd10] sm:$0xff] }
 0x248   :  { %964 = vmatpush.msrb.mxu3 %v937_v8  ;;  %1004 = vmatpush.msra.mxu1 %v938_v9  ;;  %v886_v8 = vld [vmem:[#allocation4 + $0xc48] sm:$0xff]  ;;  %v912_v9 = vld [vmem:[#allocation4 + $0xd18] sm:$0xff] }
 0x24a   :  { %v1055_v32 = vpop.eup %1054  ;;  %965 = vmatpush.msrb.mxu3 %v935_v10  ;;  %1005 = vmatpush.msra.mxu1 %v936_v13  ;;  %v883_v10 = vld [vmem:[#allocation4 + $0xc30] sm:$0xff]  ;;  %v910_v13 = vld [vmem:[#allocation4 + $0xd08] sm:$0xff] }
 0x24b   :  { %661 = vmatmul.f32.vlgmr.msrb.gmra.mxu2 %v1055_v32  ;;  %701 = vmatmul.f32.vlgmr.msra.gmra.mxu0 %v1055_v32  ;;  %v1199_v32 = vld [vmem:[#allocation6 + $0x8] sm:$0xff] }
 0x24c   :  { %943 = vmatpush.msrb.mxu2 %v907_v11  ;;  %983 = vmatpush.msra.mxu0 %v908_v12  ;;  %v644_v27 = vperm.slane %v1199_v32, 4  ;;  %v909_v11 = vld [vmem:[#allocation4 + $0xd00] sm:$0xff]  ;;  %v884_v12 = vld [vmem:[#allocation4 + $0xc38] sm:$0xff] }
 0x24d   :  { %966 = vmatpush.msrb.mxu3 %v933_v15  ;;  %1006 = vmatpush.msra.mxu1 %v934_v18  ;;  %v882_v15 = vld [vmem:[#allocation4 + $0xc28] sm:$0xff]  ;;  %v877_v18 = vld [vmem:[#allocation4 + $0xc00] sm:$0xff] }
 0x24e   :  { %944 = vmatpush.msrb.mxu2 %v905_v14  ;;  %984 = vmatpush.msra.mxu0 %v906_v16  ;;  %v881_v14 = vld [vmem:[#allocation4 + $0xc20] sm:$0xff]  ;;  %v879_v16 = vld [vmem:[#allocation4 + $0xc10] sm:$0xff] }
 0x24f   :  { %967 = vmatpush.msrb.mxu3 %v931_v20  ;;  %1007 = vmatpush.msra.mxu1 %v932_v22  ;;  %v793_v20 = vperm.slane %v1199_v32, 5 }
 0x250   :  { %945 = vmatpush.msrb.mxu2 %v903_v17  ;;  %985 = vmatpush.msra.mxu0 %v904_v19  ;;  %v880_v17 = vld [vmem:[#allocation4 + $0xc18] sm:$0xff]  ;;  %v878_v19 = vld [vmem:[#allocation4 + $0xc08] sm:$0xff] }
 0x251   :  { %968 = vmatpush.msrb.mxu3 %v929_v24  ;;  %1008 = vmatpush.msra.mxu1 %v930_v25  ;;  %v792_v25 = vperm.slane %v1202_v34, 5 }
 0x252   :  { %946 = vmatpush.msrb.mxu2 %v901_v21  ;;  %986 = vmatpush.msra.mxu0 %v902_v23 }
 0x253   :  { %969 = vmatpush.msrb.mxu3 %v927_v26  ;;  %1009 = vmatpush.msra.mxu1 %v928_v28 }
 0x254   :  { %947 = vmatpush.msrb.mxu2 %v899_v42  ;;  %987 = vmatpush.msra.mxu0 %v900_v44 }
 0x255   :  { %970 = vmatpush.msrb.mxu3 %v925_v43  ;;  %1010 = vmatpush.msra.mxu1 %v926_v45 }
 0x256   :  { %948 = vmatpush.msrb.mxu2 %v897_v46  ;;  %988 = vmatpush.msra.mxu0 %v898_v48 }
 0x257   :  { %971 = vmatpush.msrb.mxu3 %v923_v47  ;;  %1011 = vmatpush.msra.mxu1 %v924_v49 }
 0x258   :  { %949 = vmatpush.msrb.mxu2 %v895_v50  ;;  %989 = vmatpush.msra.mxu0 %v896_v52 }
 0x259   :  { %972 = vmatpush.msrb.mxu3 %v921_v51  ;;  %1012 = vmatpush.msra.mxu1 %v922_v53 }
 0x25a   :  { %950 = vmatpush.msrb.mxu2 %v893_v54  ;;  %990 = vmatpush.msra.mxu0 %v894_v56 }
 0x25b   :  { %973 = vmatpush.msrb.mxu3 %v919_v55  ;;  %1013 = vmatpush.msra.mxu1 %v920_v57 }
 0x25c   :  { %951 = vmatpush.msrb.mxu2 %v891_v58  ;;  %991 = vmatpush.msra.mxu0 %v892_v60 }
 0x25d   :  { %974 = vmatpush.msrb.mxu3 %v917_v59  ;;  %1014 = vmatpush.msra.mxu1 %v918_v61 }
 0x25e   :  { %952 = vmatpush.msrb.mxu2 %v889_v62  ;;  %992 = vmatpush.msra.mxu0 %v890_v0 }
 0x25f   :  { %975 = vmatpush.msrb.mxu3 %v915_v63  ;;  %1015 = vmatpush.msra.mxu1 %v916_v1 }
 0x260   :  { %953 = vmatpush.msrb.mxu2 %v887_v2  ;;  %993 = vmatpush.msra.mxu0 %v888_v4 }
 0x261   :  { %976 = vmatpush.msrb.mxu3 %v913_v3  ;;  %1016 = vmatpush.msra.mxu1 %v914_v5 }
 0x262   :  { %954 = vmatpush.msrb.mxu2 %v885_v6  ;;  %994 = vmatpush.msra.mxu0 %v886_v8 }
 0x263   :  { %977 = vmatpush.msrb.mxu3 %v911_v7  ;;  %1017 = vmatpush.msra.mxu1 %v912_v9 }
 0x264   :  { %955 = vmatpush.msrb.mxu2 %v883_v10  ;;  %995 = vmatpush.msra.mxu0 %v884_v12 }
 0x265   :  { %978 = vmatpush.msrb.mxu3 %v909_v11  ;;  %1018 = vmatpush.msra.mxu1 %v910_v13 }
 0x266   :  { %956 = vmatpush.msrb.mxu2 %v881_v14  ;;  %996 = vmatpush.msra.mxu0 %v882_v15 }
 0x268   :  { %957 = vmatpush.msrb.mxu2 %v879_v16  ;;  %997 = vmatpush.msra.mxu0 %v880_v17 }
 0x26a   :  { %958 = vmatpush.msrb.mxu2 %v877_v18  ;;  %998 = vmatpush.msra.mxu0 %v878_v19 }
 0x2c2   :  { %v722_v33 = vpop.f32.mrf.mxu1 }
 0x2c8   :  { %v702_v30 = vpop.f32.mrf.mxu0  ;;  %v682_v38 = vpop.f32.mrf.mxu3 }
 0x2c9   :  { %v703_v31 = vadd.f32 %v702_v30, %v644_v27 }
 0x2cb   :  { %v723_v29 = vadd.f32 %v722_v33, %v703_v31 }
 0x2cd   :  { %1056 = vtanh.f32 %v723_v29  ;;  %v942_v29 = vperm.slane %v1199_v32, 6 }
 0x2ce   :  { %v662_v36 = vpop.f32.mrf.mxu2 }
 0x2cf   :  { %v663_v37 = vadd.f32 %v662_v36, %v643_v35 }
 0x2d1   :  { %v683_v39 = vadd.f32 %v682_v38, %v663_v37 }
 0x2d3   :  { %v1057_v40 = vpop.eup %1056  ;;  %1058 = vtanh.f32 %v683_v39  ;;  %v941_v39 = vperm.slane %v1202_v34, 6 }
 0x2d4   :  { %830 = vmatmul.f32.vlgmr.msra.gmra.mxu3 %v1057_v40  ;;  %870 = vmatmul.f32.vlgmr.msrb.gmra.mxu1 %v1057_v40 }
 0x2d9   :  { %v1059_v41 = vpop.eup %1058 }
 0x2da   :  { %810 = vmatmul.f32.vlgmr.msra.gmra.mxu2 %v1059_v41  ;;  %850 = vmatmul.f32.vlgmr.msrb.gmra.mxu0 %v1059_v41 }
 0x351   :  { %v871_v23 = vpop.f32.mrf.mxu1 }
 0x357   :  { %v851_v21 = vpop.f32.mrf.mxu0  ;;  %v831_v28 = vpop.f32.mrf.mxu3 }
 0x358   :  { %v852_v22 = vadd.f32 %v851_v21, %v793_v20 }
 0x35a   :  { %v872_v24 = vadd.f32 %v871_v23, %v852_v22 }
 0x35c   :  { %1060 = vtanh.f32 %v872_v24 }
 0x35d   :  { %v811_v26 = vpop.f32.mrf.mxu2 }
 0x35e   :  { %v812_v27 = vadd.f32 %v811_v26, %v792_v25 }
 0x360   :  { %v832_v30 = vadd.f32 %v831_v28, %v812_v27 }
 0x362   :  { %v1061_v31 = vpop.eup %1060  ;;  %1062 = vtanh.f32 %v832_v30 }
 0x363   :  { %979 = vmatmul.f32.vlgmr.msrb.gmra.mxu3 %v1061_v31  ;;  %1019 = vmatmul.f32.vlgmr.msra.gmra.mxu1 %v1061_v31 }
 0x368   :  { %v1063_v33 = vpop.eup %1062 }
 0x369   :  { %959 = vmatmul.f32.vlgmr.msrb.gmra.mxu2 %v1063_v33  ;;  %999 = vmatmul.f32.vlgmr.msra.gmra.mxu0 %v1063_v33 }
 0x3e0   :  { %v1020_v37 = vpop.f32.mrf.mxu1 }
 0x3e6   :  { %v1000_v35 = vpop.f32.mrf.mxu0  ;;  %v980_v42 = vpop.f32.mrf.mxu3 }
 0x3e7   :  { %v1001_v36 = vadd.f32 %v1000_v35, %v942_v29 }
 0x3e9   :  { %v1021_v38 = vadd.f32 %v1020_v37, %v1001_v36 }
 0x3eb   :  { %1024 = vst [vmem:[%s1219_s4 + $0x8] sm:$0xff] %v1021_v38 }
 0x3ec   :  { %v960_v40 = vpop.f32.mrf.mxu2 }
 0x3ed   :  { %v961_v41 = vadd.f32 %v960_v40, %v941_v39 }
 0x3ef   :  { %v981_v43 = vadd.f32 %v980_v42, %v961_v41 }
 0x3f1   :  { %1023 = vst [vmem:[%s1219_s4] sm:$0xff] %v981_v43 }
 0x3f2   :  { %1029 = vsyncpa [#allocation3], 1 }
 0x3f3   :  { %1030 = vsyncpa [#allocation5], 1 }

</bundles_post_ra>
